<compile_context>
chip_gen: v5e
topology: v5e:2x2
jax: 0.10.0
libtpu: 0.0.40
codegen_flags: <defaults>
</compile_context>

<pallas_src>
import functools

import jax
import jax.numpy as jnp
from jax import lax
from jax.experimental import pallas as pl
from jax.experimental.pallas import tpu as pltpu


def _pair(v):
    if isinstance(v, (tuple, list)):
        return int(v[0]), int(v[1])
    return int(v), int(v)


def _win(start, size, stride):
    # Ref-side (possibly strided) window: stays in the vld slot, overlaps MXU.
    return pl.ds(start, size) if stride == 1 else pl.ds(start, size, stride)


def _conv_bn_relu_kernel(x_ref, w_ref, b_ref, o_ref, *,
                         KH, KW, SH, SW, TH, Wo, Cin, TCO, slope, use_im2col):
    # x_ref: (IH, Wp, Cin)        zero-padded NHWC input row-window for one tile
    # w_ref: (KH*KW*Cin, TCO)     BN-scale-folded weights (native dtype)
    # b_ref: (1, TCO)             folded BN bias (f32)
    # o_ref: (TH, Wo, TCO)        output tile
    if use_im2col:
        # Shallow-Cin path: build the im2col patch matrix so the MXU contraction
        # is K = KH*KW*Cin (one well-shaped matmul) instead of KH*KW tiny K=Cin
        # matmuls (<4% MXU row utilization for Cin=4).
        cols = []
        for kh in range(KH):
            for kw in range(KW):
                p = x_ref[_win(kh, TH, SH), _win(kw, Wo, SW), :]
                cols.append(p.reshape(TH * Wo, Cin))
        pmat = cols[0] if len(cols) == 1 else jnp.concatenate(cols, axis=-1)
        acc = jnp.dot(pmat, w_ref[...], preferred_element_type=jnp.float32)
    else:
        # Deep-Cin path: shift-and-matmul, slicing the refs per tap (keeps each
        # tap's working set small; native dtype into the MXU, f32 accumulation).
        acc = jnp.zeros((TH * Wo, TCO), jnp.float32)
        for kh in range(KH):
            for kw in range(KW):
                p = x_ref[_win(kh, TH, SH), _win(kw, Wo, SW), :]
                wk = w_ref[pl.ds((kh * KW + kw) * Cin, Cin), :]
                acc = acc + jnp.dot(p.reshape(TH * Wo, Cin), wk,
                                    preferred_element_type=jnp.float32)

    # Fused epilogue: BN bias (scale already folded into weights) + LeakyReLU.
    y = acc + b_ref[...]
    y = jnp.maximum(y, slope * y)          # == LeakyReLU for 0 <= slope <= 1
    o_ref[...] = y.reshape(TH, Wo, TCO).astype(o_ref.dtype)


def conv2d_batch_relu(x, weight, gamma, beta, running_mean, running_var, *,
                      stride=1, padding=0, eps=1e-5, negative_slope=0.1):
    """x: (N, Cin, H, W); weight: (Cout, Cin, KH, KW). Returns (N, Cout, Ho, Wo)."""
    N, Cin, H, W = x.shape
    Cout, Cin_w, KH, KW = weight.shape
    assert Cin == Cin_w
    SH, SW = _pair(stride)
    PH, PW = _pair(padding)
    Ho = (H + 2 * PH - KH) // SH + 1
    Wo = (W + 2 * PW - KW) // SW + 1
    Wp = W + 2 * PW
    K = KH * KW * Cin
    x_item = jnp.dtype(x.dtype).itemsize

    # ---- Fold eval-mode BatchNorm: scale -> weights (exact), bias -> epilogue.
    scale = gamma.astype(jnp.float32) / jnp.sqrt(running_var.astype(jnp.float32) + eps)
    bias = beta.astype(jnp.float32) - running_mean.astype(jnp.float32) * scale

    # ---- Lane-dense output channels: pad Cout to a multiple of 128 (unmasked
    # vst); 256-wide tiles when divisible (best for v6e/v7x MXU; 128 on v5e
    # would be marginally better but 256 is still correct/fast there).
    Cout_p = ((Cout + 127) // 128) * 128
    TCO = 256 if Cout_p % 256 == 0 else 128
    n_co = Cout_p // TCO

    # OIHW -> (KH*KW*Cin, Cout), fold the BN scale, keep the activation dtype so
    # the MXU runs the native (e.g. bf16) path, zero-pad the output channels.
    w2d = jnp.transpose(weight.astype(jnp.float32), (2, 3, 1, 0)).reshape(K, Cout)
    w2d = (w2d * scale[None, :]).astype(x.dtype)
    w2d = jnp.pad(w2d, ((0, 0), (0, Cout_p - Cout)))
    bias2 = jnp.pad(bias, (0, Cout_p - Cout)).reshape(1, Cout_p)

    use_im2col = Cin < 128

    # ---- VMEM budget (v7x: 64 MiB, v5e/v6e: 128 MiB) -> output-row tile TH.
    try:
        vmem_cap = int(pltpu.get_tpu_info().vmem_capacity_bytes)
    except Exception:
        vmem_cap = 64 * 1024 * 1024
    vmem_limit = min(int(vmem_cap * 3 // 4), 96 * 1024 * 1024)
    budget = vmem_limit // 3

    def _tile_bytes(th):
        ih = (th - 1) * SH + KH
        b = th * Wo * TCO * 4                      # f32 accumulator / epilogue
        b += 2 * th * Wo * TCO * x_item            # double-buffered output block
        b += 2 * ih * Wp * Cin * x_item            # double-buffered input block
        b += 2 * K * TCO * x_item                  # double-buffered weight block
        if use_im2col:
            b += th * Wo * K * x_item              # im2col patch matrix
        return b

    TH = min(Ho, 256)
    while TH > 1 and _tile_bytes(TH) > budget:
        TH = (TH + 1) // 2

    n_h = -(-Ho // TH)
    Ho_pad = n_h * TH
    IH = (TH - 1) * SH + KH                        # input rows per output-row tile
    H_need = (Ho_pad - 1) * SH + KH

    # ---- Layout plumbing: NCHW -> NHWC, zero-pad spatially ONCE in HBM
    # (replaces the per-grid-step zero + re-copy of the old in-kernel scratch),
    # then materialize the overlapping (halo) row windows so plain BlockSpec
    # auto-pipelining can stream bounded tiles.
    x_nhwc = jnp.transpose(x, (0, 2, 3, 1))
    pad_bot = max(0, H_need - H - PH)
    x_p = jnp.pad(x_nhwc, ((0, 0), (PH, pad_bot), (PW, PW), (0, 0)))
    x_tiles = jnp.stack(
        [lax.slice_in_dim(x_p, t * TH * SH, t * TH * SH + IH, axis=1)
         for t in range(n_h)], axis=1)             # (N, n_h, IH, Wp, Cin)

    kernel = functools.partial(
        _conv_bn_relu_kernel,
        KH=KH, KW=KW, SH=SH, SW=SW, TH=TH, Wo=Wo, Cin=Cin, TCO=TCO,
        slope=float(negative_slope), use_im2col=use_im2col)

    # ---- Grid-axis order by operand size: co innermost keeps the activation
    # tile resident across co (activation-heavy layers); co outermost keeps the
    # weight tile resident across (n, row) (weight-heavy layers).
    steps = N * n_h * n_co
    x_tile_b = IH * Wp * Cin * x_item
    w_tile_b = K * TCO * x_item
    traffic_co_inner = N * n_h * x_tile_b + (steps if n_co > 1 else n_co) * w_tile_b
    traffic_co_outer = n_co * w_tile_b + (steps if N * n_h > 1 else N * n_h) * x_tile_b
    if traffic_co_inner <= traffic_co_outer:
        grid = (N, n_h, n_co)
        x_map = lambda n, t, co: (n, t, 0, 0, 0)
        w_map = lambda n, t, co: (0, co)
        o_map = lambda n, t, co: (n, t, 0, co)
    else:
        grid = (n_co, N, n_h)
        x_map = lambda co, n, t: (n, t, 0, 0, 0)
        w_map = lambda co, n, t: (0, co)
        o_map = lambda co, n, t: (n, t, 0, co)

    flops = 2 * N * Ho * Wo * Cout * K + 3 * N * Ho * Wo * Cout
    bytes_accessed = (x_tiles.size * x_item + w2d.size * x_item
                      + bias2.size * 4 + N * Ho_pad * Wo * Cout_p * x_item)

    out_nhwc = pl.pallas_call(
        kernel,
        out_shape=jax.ShapeDtypeStruct((N, Ho_pad, Wo, Cout_p), x.dtype),
        grid=grid,
        in_specs=[
            pl.BlockSpec((None, None, IH, Wp, Cin), x_map),
            pl.BlockSpec((K, TCO), w_map),
            pl.BlockSpec((1, TCO), w_map),
        ],
        out_specs=pl.BlockSpec((None, TH, Wo, TCO), o_map),
        compiler_params=pltpu.CompilerParams(
            dimension_semantics=("parallel", "parallel", "parallel"),
            vmem_limit_bytes=vmem_limit),
        cost_estimate=pl.CostEstimate(
            flops=flops, transcendentals=0, bytes_accessed=bytes_accessed),
    )(x_tiles, w2d, bias2)

    # Drop the padded rows / channels; NHWC -> NCHW for the caller.
    out = out_nhwc[:, :Ho, :, :Cout]
    return jnp.transpose(out, (0, 3, 1, 2))


def _reference(x, weight, gamma, beta, mean, var, *, stride, padding,
               eps=1e-5, slope=0.1):
    """Pure-JAX reference: conv2d + folded eval-mode BN + LeakyReLU."""
    sh, sw = _pair(stride)
    ph, pw = _pair(padding)
    y = lax.conv_general_dilated(
        x, weight, window_strides=(sh, sw),
        padding=((ph, ph), (pw, pw)),
        dimension_numbers=("NCHW", "OIHW", "NCHW"))
    scale = gamma / jnp.sqrt(var + eps)
    bias = beta - mean * scale
    y = y * scale[None, :, None, None] + bias[None, :, None, None]
    return jnp.where(y > 0, y, slope * y)


if __name__ == "__main__":
    key = jax.random.PRNGKey(0)
    k1, k2, k3, k4, k5, k6, k7 = jax.random.split(key, 7)

    # Shapes consistent with the module: batch=2, in_channels=4, spatial=16.
    N, Cin, H, W = 2, 4, 16, 16
    x = jax.random.normal(k1, (N, Cin, H, W), dtype=jnp.float32)

    # Config 1: classic darknet 3x3 conv, stride 1, padding 1, Cout=8.
    Cout1 = 8
    w1 = jax.random.normal(k2, (Cout1, Cin, 3, 3), dtype=jnp.float32) * 0.1
    g1 = 1.0 + 0.1 * jax.random.normal(k3, (Cout1,), dtype=jnp.float32)
    b1 = 0.1 * jax.random.normal(k4, (Cout1,), dtype=jnp.float32)
    m1 = 0.1 * jax.random.normal(k5, (Cout1,), dtype=jnp.float32)
    v1 = jax.random.uniform(k6, (Cout1,), dtype=jnp.float32, minval=0.5, maxval=1.5)

    y1 = conv2d_batch_relu(x, w1, g1, b1, m1, v1, stride=1, padding=1)
    y1 = jax.block_until_ready(y1)
    r1 = _reference(x, w1, g1, b1, m1, v1, stride=1, padding=1)
    assert y1.shape == (N, Cout1, 16, 16), y1.shape
    assert jnp.allclose(y1, r1, atol=1e-2, rtol=1e-2), float(jnp.max(jnp.abs(y1 - r1)))

    # Config 2: 1x1 conv, stride 1, no padding, Cout=16 (pointwise path).
    Cout2 = 16
    w2 = jax.random.normal(k7, (Cout2, Cin, 1, 1), dtype=jnp.float32) * 0.1
    g2 = jnp.ones((Cout2,), jnp.float32)
    b2 = jnp.zeros((Cout2,), jnp.float32)
    m2 = jnp.zeros((Cout2,), jnp.float32)
    v2 = jnp.ones((Cout2,), jnp.float32)

    y2 = conv2d_batch_relu(x, w2, g2, b2, m2, v2, stride=1, padding=0)
    y2 = jax.block_until_ready(y2)
    r2 = _reference(x, w2, g2, b2, m2, v2, stride=1, padding=0)
    assert y2.shape == (N, Cout2, 16, 16), y2.shape
    assert jnp.allclose(y2, r2, atol=1e-2, rtol=1e-2), float(jnp.max(jnp.abs(y2 - r2)))

    print("KERNEL_OK")
</pallas_src>

<mosaic_0001>
module attributes {stable_mosaic.version = 11 : i64} {
  func.func @_conv_bn_relu_kernel(%arg0: i32, %arg1: i32, %arg2: i32, %arg3: memref<1x1x18x18x4xf32, #tpu.memory_space<vmem>>, %arg4: memref<36x128xf32, #tpu.memory_space<vmem>>, %arg5: memref<1x128xf32, #tpu.memory_space<vmem>>, %arg6: memref<1x16x16x128xf32, #tpu.memory_space<vmem>>) attributes {dimension_semantics = [#tpu.dimension_semantics<parallel>, #tpu.dimension_semantics<parallel>, #tpu.dimension_semantics<parallel>], iteration_bounds = array<i64: 2, 1, 1>, scalar_prefetch = 0 : i64, scratch_operands = 0 : i64, tpu.core_type = #tpu.core_type<tc>, window_params = [{transform_indices = @transform_0, window_bounds = array<i64: 1, 1, 18, 18, 4>}, {transform_indices = @transform_1, window_bounds = array<i64: 36, 128>}, {transform_indices = @transform_2, window_bounds = array<i64: 1, 128>}, {transform_indices = @transform_3, window_bounds = array<i64: 1, 16, 16, 128>}]} {
    %c0 = arith.constant 0 : index
    %c0_0 = arith.constant 0 : index
    %c0_1 = arith.constant 0 : index
    %c0_2 = arith.constant 0 : index
    %c0_3 = arith.constant 0 : index
    %0 = vector.load %arg3[%c0, %c0_0, %c0_1, %c0_2, %c0_3] : memref<1x1x18x18x4xf32, #tpu.memory_space<vmem>>, vector<1x1x16x16x4xf32>
    %1 = vector.shape_cast %0 : vector<1x1x16x16x4xf32> to vector<16x16x4xf32>
    %2 = vector.shape_cast %1 : vector<16x16x4xf32> to vector<256x4xf32>
    %c0_4 = arith.constant 0 : index
    %c0_5 = arith.constant 0 : index
    %c0_6 = arith.constant 0 : index
    %c1 = arith.constant 1 : index
    %c0_7 = arith.constant 0 : index
    %3 = vector.load %arg3[%c0_4, %c0_5, %c0_6, %c1, %c0_7] : memref<1x1x18x18x4xf32, #tpu.memory_space<vmem>>, vector<1x1x16x16x4xf32>
    %4 = vector.shape_cast %3 : vector<1x1x16x16x4xf32> to vector<16x16x4xf32>
    %5 = vector.shape_cast %4 : vector<16x16x4xf32> to vector<256x4xf32>
    %c0_8 = arith.constant 0 : index
    %c0_9 = arith.constant 0 : index
    %c0_10 = arith.constant 0 : index
    %c2 = arith.constant 2 : index
    %c0_11 = arith.constant 0 : index
    %6 = vector.load %arg3[%c0_8, %c0_9, %c0_10, %c2, %c0_11] : memref<1x1x18x18x4xf32, #tpu.memory_space<vmem>>, vector<1x1x16x16x4xf32>
    %7 = vector.shape_cast %6 : vector<1x1x16x16x4xf32> to vector<16x16x4xf32>
    %8 = vector.shape_cast %7 : vector<16x16x4xf32> to vector<256x4xf32>
    %c0_12 = arith.constant 0 : index
    %c0_13 = arith.constant 0 : index
    %c1_14 = arith.constant 1 : index
    %c0_15 = arith.constant 0 : index
    %c0_16 = arith.constant 0 : index
    %9 = vector.load %arg3[%c0_12, %c0_13, %c1_14, %c0_15, %c0_16] : memref<1x1x18x18x4xf32, #tpu.memory_space<vmem>>, vector<1x1x16x16x4xf32>
    %10 = vector.shape_cast %9 : vector<1x1x16x16x4xf32> to vector<16x16x4xf32>
    %11 = vector.shape_cast %10 : vector<16x16x4xf32> to vector<256x4xf32>
    %c0_17 = arith.constant 0 : index
    %c0_18 = arith.constant 0 : index
    %c1_19 = arith.constant 1 : index
    %c1_20 = arith.constant 1 : index
    %c0_21 = arith.constant 0 : index
    %12 = vector.load %arg3[%c0_17, %c0_18, %c1_19, %c1_20, %c0_21] : memref<1x1x18x18x4xf32, #tpu.memory_space<vmem>>, vector<1x1x16x16x4xf32>
    %13 = vector.shape_cast %12 : vector<1x1x16x16x4xf32> to vector<16x16x4xf32>
    %14 = vector.shape_cast %13 : vector<16x16x4xf32> to vector<256x4xf32>
    %c0_22 = arith.constant 0 : index
    %c0_23 = arith.constant 0 : index
    %c1_24 = arith.constant 1 : index
    %c2_25 = arith.constant 2 : index
    %c0_26 = arith.constant 0 : index
    %15 = vector.load %arg3[%c0_22, %c0_23, %c1_24, %c2_25, %c0_26] : memref<1x1x18x18x4xf32, #tpu.memory_space<vmem>>, vector<1x1x16x16x4xf32>
    %16 = vector.shape_cast %15 : vector<1x1x16x16x4xf32> to vector<16x16x4xf32>
    %17 = vector.shape_cast %16 : vector<16x16x4xf32> to vector<256x4xf32>
    %c0_27 = arith.constant 0 : index
    %c0_28 = arith.constant 0 : index
    %c2_29 = arith.constant 2 : index
    %c0_30 = arith.constant 0 : index
    %c0_31 = arith.constant 0 : index
    %18 = vector.load %arg3[%c0_27, %c0_28, %c2_29, %c0_30, %c0_31] : memref<1x1x18x18x4xf32, #tpu.memory_space<vmem>>, vector<1x1x16x16x4xf32>
    %19 = vector.shape_cast %18 : vector<1x1x16x16x4xf32> to vector<16x16x4xf32>
    %20 = vector.shape_cast %19 : vector<16x16x4xf32> to vector<256x4xf32>
    %c0_32 = arith.constant 0 : index
    %c0_33 = arith.constant 0 : index
    %c2_34 = arith.constant 2 : index
    %c1_35 = arith.constant 1 : index
    %c0_36 = arith.constant 0 : index
    %21 = vector.load %arg3[%c0_32, %c0_33, %c2_34, %c1_35, %c0_36] : memref<1x1x18x18x4xf32, #tpu.memory_space<vmem>>, vector<1x1x16x16x4xf32>
    %22 = vector.shape_cast %21 : vector<1x1x16x16x4xf32> to vector<16x16x4xf32>
    %23 = vector.shape_cast %22 : vector<16x16x4xf32> to vector<256x4xf32>
    %c0_37 = arith.constant 0 : index
    %c0_38 = arith.constant 0 : index
    %c2_39 = arith.constant 2 : index
    %c2_40 = arith.constant 2 : index
    %c0_41 = arith.constant 0 : index
    %24 = vector.load %arg3[%c0_37, %c0_38, %c2_39, %c2_40, %c0_41] : memref<1x1x18x18x4xf32, #tpu.memory_space<vmem>>, vector<1x1x16x16x4xf32>
    %25 = vector.shape_cast %24 : vector<1x1x16x16x4xf32> to vector<16x16x4xf32>
    %26 = vector.shape_cast %25 : vector<16x16x4xf32> to vector<256x4xf32>
    %27 = tpu.concatenate %2, %5, %8, %11, %14, %17, %20, %23, %26 in 1 : vector<256x4xf32>, vector<256x4xf32>, vector<256x4xf32>, vector<256x4xf32>, vector<256x4xf32>, vector<256x4xf32>, vector<256x4xf32>, vector<256x4xf32>, vector<256x4xf32> -> vector<256x36xf32>
    %c0_42 = arith.constant 0 : index
    %c0_43 = arith.constant 0 : index
    %28 = vector.load %arg4[%c0_42, %c0_43] : memref<36x128xf32, #tpu.memory_space<vmem>>, vector<36x128xf32>
    %cst = arith.constant dense<0.000000e+00> : vector<256x128xf32>
    %29 = tpu.matmul %27, %28, %cst {dimension_numbers = #tpu.dot_dimension_numbers<[1], [0], [0], [1], [0, 0, 1, 1], [], []>} : vector<256x36xf32>, vector<36x128xf32>, vector<256x128xf32> -> vector<256x128xf32>
    %c0_44 = arith.constant 0 : index
    %c0_45 = arith.constant 0 : index
    %30 = vector.load %arg5[%c0_44, %c0_45] : memref<1x128xf32, #tpu.memory_space<vmem>>, vector<1x128xf32>
    %31 = vector.broadcast %30 : vector<1x128xf32> to vector<256x128xf32>
    %32 = arith.addf %29, %31 : vector<256x128xf32>
    %cst_46 = arith.constant 1.000000e-01 : f32
    %33 = vector.broadcast %cst_46 : f32 to vector<256x128xf32>
    %34 = arith.mulf %33, %32 : vector<256x128xf32>
    %35 = arith.maximumf %32, %34 : vector<256x128xf32>
    %36 = vector.shape_cast %35 : vector<256x128xf32> to vector<16x16x128xf32>
    %c0_47 = arith.constant 0 : index
    %c0_48 = arith.constant 0 : index
    %c0_49 = arith.constant 0 : index
    %c0_50 = arith.constant 0 : index
    %37 = vector.load %arg6[%c0_47, %c0_48, %c0_49, %c0_50] : memref<1x16x16x128xf32, #tpu.memory_space<vmem>>, vector<1x16x16x128xf32>
    %38 = vector.shape_cast %37 : vector<1x16x16x128xf32> to vector<16x16x128xf32>
    %39 = vector.shape_cast %36 : vector<16x16x128xf32> to vector<1x16x16x128xf32>
    tpu.vector_store %arg6[%c0_47, %c0_48, %c0_49, %c0_50], %39 {strides = array<i32>} : memref<1x16x16x128xf32, #tpu.memory_space<vmem>>, vector<1x16x16x128xf32>,
    return
  }
  func.func @transform_0(%arg0: i32, %arg1: i32, %arg2: i32) -> (i32, i32, i32, i32, i32) {
    %c0_i32 = arith.constant 0 : i32
    %c0_i32_0 = arith.constant 0 : i32
    %c0_i32_1 = arith.constant 0 : i32
    %c0_i32_2 = arith.constant 0 : i32
    return %arg0, %arg1, %c0_i32, %c0_i32_0, %c0_i32_1 : i32, i32, i32, i32, i32
  }
  func.func @transform_1(%arg0: i32, %arg1: i32, %arg2: i32) -> (i32, i32) {
    %c0_i32 = arith.constant 0 : i32
    %c0_i32_0 = arith.constant 0 : i32
    return %c0_i32, %arg2 : i32, i32
  }
  func.func @transform_2(%arg0: i32, %arg1: i32, %arg2: i32) -> (i32, i32) {
    %c0_i32 = arith.constant 0 : i32
    %c0_i32_0 = arith.constant 0 : i32
    return %c0_i32, %arg2 : i32, i32
  }
  func.func @transform_3(%arg0: i32, %arg1: i32, %arg2: i32) -> (i32, i32, i32, i32) {
    %c0_i32 = arith.constant 0 : i32
    %c0_i32_0 = arith.constant 0 : i32
    return %arg0, %arg1, %c0_i32, %arg2 : i32, i32, i32, i32
  }
}

</mosaic_0001>

<bundles_post_ra>
// kernel: tpu_custom_call.1
= control target key start
LH: loop header
LB: loop body
LE: loop exit
PB: predicated region body
PF: predicated region fallthrough
CT: control target
= control target key end

     0   :  { %8 = vsyncpa [#allocation3], 0  ;;  %s4550_s0 = inlined_call_operand.vmem [shape: f32[2,1,18,18,4], index: 0, kind: input, shape index: {}]   ;;  %s4551_s1 = inlined_call_operand.vmem [shape: f32[36,128], index: 1, kind: input, shape index: {}]   ;;  %s4552_s2 = inlined_call_operand.vmem [shape: f32[1,128], index: 2, kind: input, shape index: {}]   ;;  %s4553_s3 = inlined_call_operand.hbm [shape: f32[2,16,16,128], index: 3, kind: output, shape index: {}]  }
   0x1   :  { %10 = vsyncpa [#allocation3 + $0x1], 0  ;;  %s2702_s12 = smov 0   ;;  %s2704_s13 = smov 0  }
   0x2   :  { %s2706_s14 = smov 0   ;;  %s2708_s15 = smov 0  }
   0x3   :  { %s2710_s16 = smov 0   ;;  %s2712_s17 = smov 0  }
   0x4 LB: > { %s2268_s18 = sadd.s32 4294967295, %s2671_s17   ;;  %s2269_s19 = sadd.s32 4294967294, %s2671_s17   ;;  %s2671_s17 = sphi %s2712_s17, %s16_s17   ;;  %s2667_s16 = sphi %s2710_s16, %s4841_s16   ;;  %s2663_s15 = sphi %s2708_s15, %s4840_s15   ;;  %s2659_s14 = sphi %s2706_s14, %s4839_s14   ;;  %s2655_s13 = sphi %s2704_s13, %s4838_s13   ;;  %s2651_s12 = sphi %s2702_s12, %s4837_s12  }
   0x5   : > { %s35_s20 = sadd.s32 1, %s2667_s16  ;;  %s126_s21 = sadd.s32 1, %s2659_s14 }
   0x6   : > { %p37_p0 = scmp.ge.s32.totalorder %s35_s20, 2  ;;  %p136_p1 = scmp.ne.s32.totalorder %s2659_s14, %s2655_s13 }
   0x7   : > { %p137_p2 = scmp.eq.s32.totalorder %s2268_s18, 1  ;;  %p142_p3 = scmp.ne.s32.totalorder %s2655_s13, %s2651_s12 }
   0x8   : > { %s4843_s20 = smov (%p37_p0, %s35_s20), 0  ;;  %p143_p5 = scmp.eq.s32.totalorder %s2269_s19, 1 }
   0x9   : > { %p2742_p4 = por %p137_p2, %p136_p1  ;;  %s119_s23 = ssub.s32 %s2667_s16, %s4843_s20 }
   0xa   : > { %p2274_p6 = scmp.ge.s32.totalorder %s2671_s17, 1  ;;  %p124_p7 = scmp.eq.s32.totalorder %s119_s23, 0 }
   0xb   : > { %p2749_p8 = por %p143_p5, %p142_p3  ;;  %p186_p9 = scmp.lt.s32.totalorder %s2671_s17, 3 }
   0xc   : > { %s2755_s25 = scalar_select %p124_p7, %s2659_s14, %s126_s21  }
   0xd   : > { %p187_p10 = pnand %p2274_p6, %p186_p9 }
   0xf   : > { %190 = sbr.rel (%p187_p10) target bundleno = 961 (0x3c1), region = 32 }
  0x14   : > { %p221_p11 = scmp.lt.s32.totalorder %s2663_s15, 1  ;;  %s2673_s4 = smov 4   ;;  %vm1552_vm0 = vcmask 31744   ;;  %vm1585_vm1 = vcmask 64512   ;;  %vm1618_vm2 = vcmask 97280   ;;  %vm1651_vm3 = vcmask 130048  }
  0x15   : > { %s2674_s5 = smov 8   ;;  %s2675_s6 = smov 12   ;;  %vm1684_vm4 = vcmask 162816   ;;  %vm1717_vm5 = vcmask 195584   ;;  %vm1922_vm6 = vcmask 1043456   ;;  %vm1783_vm7 = vcmask 261120  }
  0x16   : > { %s222_s26 = scalar_select %p221_p11, %s2663_s15, 1  ;;  %vm1750_vm8 = vcmask 228352   ;;  %vm1825_vm9 = vcmask 293888  }
  0x17   : > { %s2676_s7 = smov 16   ;;  %s2677_s8 = smov 20  }
  0x18   : > { %s2523_s27 = smul.u32 432, %s222_s26  ;;  %s2678_s9 = smov 24  }
  0x19   : > { %s2679_s10 = smov 28   ;;  %s2680_s11 = smov 32  }
  0x1a   : > { %s2762_s30 = scalar_lea.vmem %s4550_s0, %s2523_s27 }
  0x1b   : > { %v2765_v0 = vld [vmem:[%s2762_s30 + $0x31] sm:$0xff]  ;;  %v2768_v1 = vld [vmem:[%s2762_s30 + $0x19] sm:$0xff]  ;;  %v270_v2 = vld [vmem:[%s2762_s30 + $0x1] sm:$0xff] }
  0x1c   : > { %568 = vrot.lane.b32.xlu2 %v2765_v0, %s2673_s4  ;;  %564 = vrot.lane.b32.xlu1 %v2768_v1, %s2673_s4  ;;  %v2777_v3 = vld [vmem:[%s2762_s30 + $0x39] sm:$0xff]  ;;  %v2780_v4 = vld [vmem:[%s2762_s30 + $0x21] sm:$0xff] }
  0x1d   : > { %560 = vrot.lane.b32.xlu0 %v270_v2, %s2673_s4  ;;  %v271_v5 = vld [vmem:[%s2762_s30 + $0x9] sm:$0xff]  ;;  %v2789_v6 = vld [vmem:[%s2762_s30 + $0x61] sm:$0xff]  ;;  %v2792_v7 = vld [vmem:[%s2762_s30 + $0x51] sm:$0xff] }
  0x1e   : > { %v2795_v8 = vld [vmem:[%s2762_s30 + $0x49] sm:$0xff]  ;;  %v2804_v9 = vld [vmem:[%s2762_s30 + $0x81] sm:$0xff]  ;;  %v2807_v10 = vld [vmem:[%s2762_s30 + $0x79] sm:$0xff] }
  0x1f   : > { %v2810_v11 = vld [vmem:[%s2762_s30 + $0x69] sm:$0xff]  ;;  %v2822_v13 = vld [vmem:[%s2762_s30 + $0x99] sm:$0xff]  ;;  %v2825_v14 = vld [vmem:[%s2762_s30 + $0x91] sm:$0xff] }
  0x20   : > { %v2819_v12 = vld [vmem:[%s2762_s30 + $0xa9] sm:$0xff]  ;;  %v2837_v16 = vld [vmem:[%s2762_s30 + $0xc1] sm:$0xff]  ;;  %v2840_v17 = vld [vmem:[%s2762_s30 + $0xb1] sm:$0xff] }
  0x21   : > { %v2834_v15 = vld [vmem:[%s2762_s30 + $0xc9] sm:$0xff]  ;;  %v2849_v18 = vld [vmem:[%s2762_s30 + $0xf1] sm:$0xff]  ;;  %v2852_v19 = vld [vmem:[%s2762_s30 + $0xe1] sm:$0xff] }
  0x22   : > { %v2855_v20 = vld [vmem:[%s2762_s30 + $0xd9] sm:$0xff]  ;;  %v2864_v21 = vld [vmem:[%s2762_s30 + $0x111] sm:$0xff]  ;;  %v2867_v22 = vld [vmem:[%s2762_s30 + $0x109] sm:$0xff] }
  0x23   : > { %v2870_v23 = vld [vmem:[%s2762_s30 + $0xf9] sm:$0xff]  ;;  %v2882_v25 = vld [vmem:[%s2762_s30 + $0x129] sm:$0xff]  ;;  %v2885_v26 = vld [vmem:[%s2762_s30 + $0x121] sm:$0xff] }
  0x24   : > { %570 = vrot.lane.b32.xlu2 %v2777_v3, %s2673_s4  ;;  %566 = vrot.lane.b32.xlu1 %v2780_v4, %s2673_s4  ;;  %v2879_v24 = vld [vmem:[%s2762_s30 + $0x139] sm:$0xff]  ;;  %v2897_v28 = vld [vmem:[%s2762_s30 + $0x151] sm:$0xff] }
  0x25   : > { %562 = vrot.lane.b32.xlu0 %v271_v5, %s2673_s4  ;;  %v2894_v27 = vld [vmem:[%s2762_s30 + $0x159] sm:$0xff]  ;;  %v2900_v29 = vld [vmem:[%s2762_s30 + $0x141] sm:$0xff]  ;;  %v2910_v31 = vld [vmem:[%s2762_s30 + $0x171] sm:$0xff] }
  0x26   : > { %v302_v30 = vld [vmem:[%s2762_s30 + $0x2] sm:$0xff]  ;;  %v2924_v34 = vld [vmem:[%s2762_s30 + $0x1a] sm:$0xff]  ;;  %v303_v35 = vld [vmem:[%s2762_s30 + $0xa] sm:$0xff] }
  0x27   : > { %v2913_v32 = vld [vmem:[%s2762_s30 + $0x169] sm:$0xff]  ;;  %v2938_v38 = vld [vmem:[%s2762_s30 + $0x3a] sm:$0xff]  ;;  %v2941_v39 = vld [vmem:[%s2762_s30 + $0x32] sm:$0xff] }
  0x28   : > { %v2921_v33 = vld [vmem:[%s2762_s30 + $0x22] sm:$0xff]  ;;  %v2935_v37 = vld [vmem:[%s2762_s30 + $0x4a] sm:$0xff]  ;;  %v2958_v43 = vld [vmem:[%s2762_s30 + $0x52] sm:$0xff] }
  0x29   : > { %v2952_v41 = vld [vmem:[%s2762_s30 + $0x6a] sm:$0xff]  ;;  %v2955_v42 = vld [vmem:[%s2762_s30 + $0x62] sm:$0xff]  ;;  %v2969_v45 = vld [vmem:[%s2762_s30 + $0x92] sm:$0xff] }
  0x2a   : > { %v2972_v46 = vld [vmem:[%s2762_s30 + $0x82] sm:$0xff]  ;;  %v2975_v47 = vld [vmem:[%s2762_s30 + $0x7a] sm:$0xff]  ;;  %v2990_v51 = vld [vmem:[%s2762_s30 + $0xb2] sm:$0xff] }
  0x2b   : > { %v2993_v52 = vld [vmem:[%s2762_s30 + $0xaa] sm:$0xff]  ;;  %v2996_v53 = vld [vmem:[%s2762_s30 + $0x9a] sm:$0xff]  ;;  %v3017_v59 = vld [vmem:[%s2762_s30 + $0xc2] sm:$0xff] }
  0x2c   : > { %576 = vrot.lane.b32.xlu2 %v2789_v6, %s2673_s4  ;;  %574 = vrot.lane.b32.xlu1 %v2792_v7, %s2673_s4  ;;  %v3011_v57 = vld [vmem:[%s2762_s30 + $0xda] sm:$0xff]  ;;  %v3014_v58 = vld [vmem:[%s2762_s30 + $0xca] sm:$0xff] }
  0x2d   : > { %572 = vrot.lane.b32.xlu0 %v2795_v8, %s2673_s4  ;;  %v3032_v63 = vld [vmem:[%s2762_s30 + $0xfa] sm:$0xff]  ;;  %v3035_v2 = vld [vmem:[%s2762_s30 + $0xf2] sm:$0xff]  ;;  %v3038_v5 = vld [vmem:[%s2762_s30 + $0xe2] sm:$0xff] }
  0x34   : > { %582 = vrot.lane.b32.xlu2 %v2804_v9, %s2673_s4  ;;  %580 = vrot.lane.b32.xlu1 %v2807_v10, %s2673_s4 }
  0x35   : > { %578 = vrot.lane.b32.xlu0 %v2810_v11, %s2673_s4 }
  0x3c   : > { %588 = vrot.lane.b32.xlu2 %v2819_v12, %s2673_s4  ;;  %586 = vrot.lane.b32.xlu1 %v2822_v13, %s2673_s4 }
  0x3d   : > { %584 = vrot.lane.b32.xlu0 %v2825_v14, %s2673_s4 }
  0x44   : > { %594 = vrot.lane.b32.xlu2 %v2834_v15, %s2673_s4  ;;  %592 = vrot.lane.b32.xlu1 %v2837_v16, %s2673_s4 }
  0x45   : > { %590 = vrot.lane.b32.xlu0 %v2840_v17, %s2673_s4 }
  0x4c   : > { %600 = vrot.lane.b32.xlu2 %v2849_v18, %s2673_s4  ;;  %598 = vrot.lane.b32.xlu1 %v2852_v19, %s2673_s4 }
  0x4d   : > { %596 = vrot.lane.b32.xlu0 %v2855_v20, %s2673_s4 }
  0x54   : > { %606 = vrot.lane.b32.xlu2 %v2864_v21, %s2673_s4  ;;  %604 = vrot.lane.b32.xlu1 %v2867_v22, %s2673_s4 }
  0x55   : > { %602 = vrot.lane.b32.xlu0 %v2870_v23, %s2673_s4 }
  0x5c   : > { %612 = vrot.lane.b32.xlu2 %v2879_v24, %s2673_s4  ;;  %610 = vrot.lane.b32.xlu1 %v2882_v25, %s2673_s4 }
  0x5d   : > { %608 = vrot.lane.b32.xlu0 %v2885_v26, %s2673_s4 }
  0x64   : > { %618 = vrot.lane.b32.xlu2 %v2894_v27, %s2673_s4  ;;  %616 = vrot.lane.b32.xlu1 %v2897_v28, %s2673_s4 }
  0x65   : > { %614 = vrot.lane.b32.xlu0 %v2900_v29, %s2673_s4 }
  0x6c   : > { %688 = vrot.lane.b32.xlu2 %v302_v30, %s2674_s5  ;;  %622 = vrot.lane.b32.xlu1 %v2910_v31, %s2673_s4 }
  0x6d   : > { %620 = vrot.lane.b32.xlu0 %v2913_v32, %s2673_s4 }
  0x74   : > { %694 = vrot.lane.b32.xlu2 %v2921_v33, %s2674_s5  ;;  %692 = vrot.lane.b32.xlu1 %v2924_v34, %s2674_s5 }
  0x75   : > { %690 = vrot.lane.b32.xlu0 %v303_v35, %s2674_s5 }
  0x76   : > { %v2932_v36 = vpop.permute.xlu2 %568 }
  0x77   : > { %4604 = vst [vmem:[#allocation5_spill] sm:$0xff] %v2932_v36  ;;  %v3077_v36 = vld [vmem:[%s2762_s30 + $0x13a] sm:$0xff] }
  0x7c   : > { %700 = vrot.lane.b32.xlu2 %v2935_v37, %s2674_s5  ;;  %698 = vrot.lane.b32.xlu1 %v2938_v38, %s2674_s5 }
  0x7d   : > { %696 = vrot.lane.b32.xlu0 %v2941_v39, %s2674_s5 }
  0x7e   : > { %v2949_v40 = vpop.permute.xlu2 %570 }
  0x7f   : > { %4605 = vst [vmem:[#allocation6_spill] sm:$0xff] %v2949_v40  ;;  %v3056_v40 = vld [vmem:[%s2762_s30 + $0x112] sm:$0xff] }
  0x84   : > { %706 = vrot.lane.b32.xlu2 %v2952_v41, %s2674_s5  ;;  %704 = vrot.lane.b32.xlu1 %v2955_v42, %s2674_s5 }
  0x85   : > { %702 = vrot.lane.b32.xlu0 %v2958_v43, %s2674_s5 }
  0x86   : > { %v2966_v44 = vpop.permute.xlu2 %576 }
  0x87   : > { %4606 = vst [vmem:[#allocation7_spill] sm:$0xff] %v2966_v44 }
  0x8c   : > { %712 = vrot.lane.b32.xlu2 %v2969_v45, %s2674_s5  ;;  %710 = vrot.lane.b32.xlu1 %v2972_v46, %s2674_s5 }
  0x8d   : > { %708 = vrot.lane.b32.xlu0 %v2975_v47, %s2674_s5 }
  0x8e   : > { %v2983_v48 = vpop.permute.xlu2 %582  ;;  %v2985_v49 = vpop.permute.xlu1 %564 }
  0x8f   : > { %4607 = vst [vmem:[#allocation8_spill] sm:$0xff] %v2983_v48  ;;  %v2987_v50 = vpop.permute.xlu0 %560  ;;  %v3053_v48 = vld [vmem:[%s2762_s30 + $0x122] sm:$0xff] }
  0x90   : > { %4608 = vst [vmem:[#allocation9_spill] sm:$0xff] %v2985_v49  ;;  %v3116_v49 = vld [vmem:[%s2762_s30 + $0x172] sm:$0xff] }
  0x91   : > { %4609 = vst [vmem:[#allocation10_spill] sm:$0xff] %v2987_v50 }
  0x92   : > { %4632 = vst [vmem:[#allocation33_spill] sm:$0xff] %v3116_v49 }
  0x94   : > { %718 = vrot.lane.b32.xlu2 %v2990_v51, %s2674_s5  ;;  %716 = vrot.lane.b32.xlu1 %v2993_v52, %s2674_s5 }
  0x95   : > { %714 = vrot.lane.b32.xlu0 %v2996_v53, %s2674_s5 }
  0x96   : > { %v3004_v54 = vpop.permute.xlu2 %588  ;;  %v3006_v55 = vpop.permute.xlu1 %566 }
  0x97   : > { %4610 = vst [vmem:[#allocation11_spill] sm:$0xff] %v3004_v54  ;;  %v3008_v56 = vpop.permute.xlu0 %562  ;;  %v3101_v54 = vld [vmem:[%s2762_s30 + $0x152] sm:$0xff] }
  0x98   : > { %4611 = vst [vmem:[#allocation12_spill] sm:$0xff] %v3006_v55  ;;  %v3119_v55 = vld [vmem:[%s2762_s30 + $0x18] sm:$0xff] }
  0x99   : > { %4612 = vst [vmem:[#allocation13_spill] sm:$0xff] %v3008_v56  ;;  %v3080_v56 = vld [vmem:[%s2762_s30 + $0x12a] sm:$0xff] }
  0x9a   : > { %4628 = vst [vmem:[#allocation29_spill] sm:$0xff] %v3101_v54 }
  0x9b   : > { %4633 = vst [vmem:[#allocation34_spill] sm:$0xff] %v3119_v55 }
  0x9c   : > { %724 = vrot.lane.b32.xlu2 %v3011_v57, %s2674_s5  ;;  %722 = vrot.lane.b32.xlu1 %v3014_v58, %s2674_s5 }
  0x9d   : > { %720 = vrot.lane.b32.xlu0 %v3017_v59, %s2674_s5 }
  0x9e   : > { %v3025_v60 = vpop.permute.xlu2 %594  ;;  %v3027_v61 = vpop.permute.xlu1 %574 }
  0x9f   : > { %4613 = vst [vmem:[#allocation14_spill] sm:$0xff] %v3025_v60  ;;  %v3029_v62 = vpop.permute.xlu0 %572  ;;  %v3095_v60 = vld [vmem:[%s2762_s30 + $0x16a] sm:$0xff] }
  0xa0   : > { %4614 = vst [vmem:[#allocation15_spill] sm:$0xff] %v3027_v61  ;;  %v3074_v61 = vld [vmem:[%s2762_s30 + $0x142] sm:$0xff] }
  0xa1   : > { %4615 = vst [vmem:[#allocation16_spill] sm:$0xff] %v3029_v62  ;;  %v3059_v62 = vld [vmem:[%s2762_s30 + $0x10a] sm:$0xff] }
  0xa2   : > { %4622 = vst [vmem:[#allocation23_spill] sm:$0xff] %v3074_v61 }
  0xa3   : > { %4626 = vst [vmem:[#allocation27_spill] sm:$0xff] %v3095_v60 }
  0xa4   : > { %730 = vrot.lane.b32.xlu2 %v3032_v63, %s2674_s5  ;;  %728 = vrot.lane.b32.xlu1 %v3035_v2, %s2674_s5 }
  0xa5   : > { %726 = vrot.lane.b32.xlu0 %v3038_v5, %s2674_s5 }
  0xa6   : > { %v3046_v30 = vpop.permute.xlu2 %600  ;;  %v3048_v35 = vpop.permute.xlu1 %580 }
  0xa7   : > { %4616 = vst [vmem:[#allocation17_spill] sm:$0xff] %v3046_v30  ;;  %v3050_v44 = vpop.permute.xlu0 %578 }
  0xa8   : > { %4617 = vst [vmem:[#allocation18_spill] sm:$0xff] %v3048_v35 }
  0xa9   : > { %4618 = vst [vmem:[#allocation19_spill] sm:$0xff] %v3050_v44 }
  0xac   : > { %736 = vrot.lane.b32.xlu2 %v3053_v48, %s2674_s5  ;;  %734 = vrot.lane.b32.xlu1 %v3056_v40, %s2674_s5 }
  0xad   : > { %732 = vrot.lane.b32.xlu0 %v3059_v62, %s2674_s5 }
  0xae   : > { %v3067_v35 = vpop.permute.xlu2 %606  ;;  %v3069_v44 = vpop.permute.xlu1 %586 }
  0xaf   : > { %4619 = vst [vmem:[#allocation20_spill] sm:$0xff] %v3067_v35  ;;  %v3071_v50 = vpop.permute.xlu0 %584 }
  0xb0   : > { %4620 = vst [vmem:[#allocation21_spill] sm:$0xff] %v3069_v44  ;;  %v3098_v44 = vld [vmem:[%s2762_s30 + $0x15a] sm:$0xff] }
  0xb1   : > { %4621 = vst [vmem:[#allocation22_spill] sm:$0xff] %v3071_v50 }
  0xb2   : > { %4627 = vst [vmem:[#allocation28_spill] sm:$0xff] %v3098_v44 }
  0xb4   : > { %742 = vrot.lane.b32.xlu2 %v3074_v61, %s2674_s5  ;;  %740 = vrot.lane.b32.xlu1 %v3077_v36, %s2674_s5  ;;  %v3137_v61 = vld [vmem:[%s2762_s30 + $0x38] sm:$0xff] }
  0xb5   : > { %738 = vrot.lane.b32.xlu0 %v3080_v56, %s2674_s5  ;;  %4638 = vst [vmem:[#allocation39_spill] sm:$0xff] %v3137_v61 }
  0xb6   : > { %v3088_v35 = vpop.permute.xlu2 %612  ;;  %v3090_v50 = vpop.permute.xlu1 %592 }
  0xb7   : > { %4623 = vst [vmem:[#allocation24_spill] sm:$0xff] %v3088_v35  ;;  %v3092_v30 = vpop.permute.xlu0 %590 }
  0xb8   : > { %4624 = vst [vmem:[#allocation25_spill] sm:$0xff] %v3090_v50 }
  0xb9   : > { %4625 = vst [vmem:[#allocation26_spill] sm:$0xff] %v3092_v30 }
  0xbc   : > { %748 = vrot.lane.b32.xlu2 %v3095_v60, %s2674_s5  ;;  %746 = vrot.lane.b32.xlu1 %v3098_v44, %s2674_s5  ;;  %v3122_v60 = vld [vmem:[%s2762_s30 + $0x20] sm:$0xff]  ;;  %v3143_v44 = vld [vmem:[%s2762_s30 + $0x30] sm:$0xff] }
  0xbd   : > { %744 = vrot.lane.b32.xlu0 %v3101_v54, %s2674_s5  ;;  %4634 = vst [vmem:[#allocation35_spill] sm:$0xff] %v3122_v60  ;;  %v3140_v54 = vld [vmem:[%s2762_s30 + $0x48] sm:$0xff] }
  0xbe   : > { %v3109_v35 = vpop.permute.xlu2 %618  ;;  %v3111_v50 = vpop.permute.xlu1 %598  ;;  %4639 = vst [vmem:[#allocation40_spill] sm:$0xff] %v3140_v54 }
  0xbf   : > { %4629 = vst [vmem:[#allocation30_spill] sm:$0xff] %v3109_v35  ;;  %v3113_v30 = vpop.permute.xlu0 %596 }
  0xc0   : > { %4630 = vst [vmem:[#allocation31_spill] sm:$0xff] %v3111_v50 }
  0xc1   : > { %4631 = vst [vmem:[#allocation32_spill] sm:$0xff] %v3113_v30 }
  0xc2   : > { %4640 = vst [vmem:[#allocation41_spill] sm:$0xff] %v3143_v44 }
  0xc4   : > { %818 = vrot.lane.b32.xlu2 %v3122_v60, %s2675_s6  ;;  %816 = vrot.lane.b32.xlu1 %v3119_v55, %s2675_s6  ;;  %v246_v60 = vld [vmem:[%s2762_s30 + $0x60] sm:$0xff] }
  0xc5   : > { %750 = vrot.lane.b32.xlu0 %v3116_v49, %s2674_s5  ;;  %v3162_v49 = vld [vmem:[%s2762_s30 + $0x50] sm:$0xff] }
  0xc6   : > { %v3130_v35 = vpop.permute.xlu2 %688  ;;  %v3132_v50 = vpop.permute.xlu1 %604  ;;  %4645 = vst [vmem:[#allocation46_spill] sm:$0xff] %v3162_v49 }
  0xc7   : > { %4635 = vst [vmem:[#allocation36_spill] sm:$0xff] %v3130_v35  ;;  %v3134_v30 = vpop.permute.xlu0 %602 }
  0xc8   : > { %4636 = vst [vmem:[#allocation37_spill] sm:$0xff] %v3132_v50  ;;  %v3159_v50 = vld [vmem:[%s2762_s30 + $0x68] sm:$0xff] }
  0xc9   : > { %4637 = vst [vmem:[#allocation38_spill] sm:$0xff] %v3134_v30 }
  0xca   : > { %4644 = vst [vmem:[#allocation45_spill] sm:$0xff] %v3159_v50 }
  0xcc   : > { %824 = vrot.lane.b32.xlu2 %v3140_v54, %s2675_s6  ;;  %822 = vrot.lane.b32.xlu1 %v3137_v61, %s2675_s6 }
  0xcd   : > { %820 = vrot.lane.b32.xlu0 %v3143_v44, %s2675_s6 }
  0xce   : > { %v3151_v35 = vpop.permute.xlu2 %694  ;;  %v3153_v30 = vpop.permute.xlu1 %610 }
  0xcf   : > { %4641 = vst [vmem:[#allocation42_spill] sm:$0xff] %v3151_v35  ;;  %v3155_v55 = vpop.permute.xlu0 %608  ;;  %v3180_v35 = vld [vmem:[%s2762_s30 + $0x78] sm:$0xff] }
  0xd0   : > { %4642 = vst [vmem:[#allocation43_spill] sm:$0xff] %v3153_v30  ;;  %v3177_v30 = vld [vmem:[%s2762_s30 + $0x90] sm:$0xff] }
  0xd1   : > { %4643 = vst [vmem:[#allocation44_spill] sm:$0xff] %v3155_v55  ;;  %v249_v55 = vld [vmem:[%s2762_s30 + $0x80] sm:$0xff] }
  0xd2   : > { %4649 = vst [vmem:[#allocation50_spill] sm:$0xff] %v3177_v30 }
  0xd3   : > { %4650 = vst [vmem:[#allocation51_spill] sm:$0xff] %v3180_v35 }
  0xd4   : > { %830 = vrot.lane.b32.xlu2 %v3159_v50, %s2675_s6  ;;  %828 = vrot.lane.b32.xlu1 %v246_v60, %s2675_s6  ;;  %v3194_v50 = vld [vmem:[%s2762_s30 + $0xa8] sm:$0xff] }
  0xd5   : > { %826 = vrot.lane.b32.xlu0 %v3162_v49, %s2675_s6  ;;  %4654 = vst [vmem:[#allocation55_spill] sm:$0xff] %v3194_v50  ;;  %v3200_v49 = vld [vmem:[%s2762_s30 + $0x98] sm:$0xff] }
  0xd6   : > { %v3169_v61 = vpop.permute.xlu2 %700  ;;  %v3171_v44 = vpop.permute.xlu1 %616  ;;  %4656 = vst [vmem:[#allocation57_spill] sm:$0xff] %v3200_v49 }
  0xd7   : > { %4646 = vst [vmem:[#allocation47_spill] sm:$0xff] %v3169_v61  ;;  %v3173_v54 = vpop.permute.xlu0 %614 }
  0xd8   : > { %4647 = vst [vmem:[#allocation48_spill] sm:$0xff] %v3171_v44 }
  0xd9   : > { %4648 = vst [vmem:[#allocation49_spill] sm:$0xff] %v3173_v54  ;;  %v3197_v54 = vld [vmem:[%s2762_s30 + $0xb0] sm:$0xff] }
  0xda   : > { %4655 = vst [vmem:[#allocation56_spill] sm:$0xff] %v3197_v54 }
  0xdc   : > { %836 = vrot.lane.b32.xlu2 %v3177_v30, %s2675_s6  ;;  %834 = vrot.lane.b32.xlu1 %v249_v55, %s2675_s6  ;;  %v3215_v30 = vld [vmem:[%s2762_s30 + $0xc8] sm:$0xff] }
  0xdd   : > { %832 = vrot.lane.b32.xlu0 %v3180_v35, %s2675_s6  ;;  %4660 = vst [vmem:[#allocation61_spill] sm:$0xff] %v3215_v30  ;;  %v3221_v35 = vld [vmem:[%s2762_s30 + $0xc0] sm:$0xff] }
  0xde   : > { %v3187_v60 = vpop.permute.xlu2 %706  ;;  %v3189_v61 = vpop.permute.xlu1 %622  ;;  %4662 = vst [vmem:[#allocation63_spill] sm:$0xff] %v3221_v35 }
  0xdf   : > { %4651 = vst [vmem:[#allocation52_spill] sm:$0xff] %v3187_v60  ;;  %v3191_v44 = vpop.permute.xlu0 %620 }
  0xe0   : > { %4652 = vst [vmem:[#allocation53_spill] sm:$0xff] %v3189_v61  ;;  %v3218_v61 = vld [vmem:[%s2762_s30 + $0xd8] sm:$0xff] }
  0xe1   : > { %4653 = vst [vmem:[#allocation54_spill] sm:$0xff] %v3191_v44 }
  0xe2   : > { %4661 = vst [vmem:[#allocation62_spill] sm:$0xff] %v3218_v61 }
  0xe4   : > { %842 = vrot.lane.b32.xlu2 %v3197_v54, %s2675_s6  ;;  %840 = vrot.lane.b32.xlu1 %v3194_v50, %s2675_s6  ;;  %v3236_v54 = vld [vmem:[%s2762_s30 + $0xf0] sm:$0xff] }
  0xe5   : > { %838 = vrot.lane.b32.xlu0 %v3200_v49, %s2675_s6  ;;  %4666 = vst [vmem:[#allocation67_spill] sm:$0xff] %v3236_v54  ;;  %v3242_v49 = vld [vmem:[%s2762_s30 + $0xe0] sm:$0xff] }
  0xe6   : > { %v3208_v55 = vpop.permute.xlu2 %712  ;;  %v3210_v60 = vpop.permute.xlu1 %692  ;;  %4668 = vst [vmem:[#allocation69_spill] sm:$0xff] %v3242_v49 }
  0xe7   : > { %4657 = vst [vmem:[#allocation58_spill] sm:$0xff] %v3208_v55  ;;  %v3212_v44 = vpop.permute.xlu0 %690 }
  0xe8   : > { %4658 = vst [vmem:[#allocation59_spill] sm:$0xff] %v3210_v60  ;;  %v3239_v60 = vld [vmem:[%s2762_s30 + $0xf8] sm:$0xff] }
  0xe9   : > { %4659 = vst [vmem:[#allocation60_spill] sm:$0xff] %v3212_v44 }
  0xea   : > { %4667 = vst [vmem:[#allocation68_spill] sm:$0xff] %v3239_v60 }
  0xec   : > { %848 = vrot.lane.b32.xlu2 %v3218_v61, %s2675_s6  ;;  %846 = vrot.lane.b32.xlu1 %v3215_v30, %s2675_s6  ;;  %v3257_v61 = vld [vmem:[%s2762_s30 + $0x110] sm:$0xff] }
  0xed   : > { %844 = vrot.lane.b32.xlu0 %v3221_v35, %s2675_s6  ;;  %4672 = vst [vmem:[#allocation73_spill] sm:$0xff] %v3257_v61  ;;  %v3263_v35 = vld [vmem:[%s2762_s30 + $0x108] sm:$0xff] }
  0xee   : > { %v3229_v55 = vpop.permute.xlu2 %718  ;;  %v3231_v44 = vpop.permute.xlu1 %698  ;;  %4674 = vst [vmem:[#allocation75_spill] sm:$0xff] %v3263_v35 }
  0xef   : > { %4663 = vst [vmem:[#allocation64_spill] sm:$0xff] %v3229_v55  ;;  %v3233_v50 = vpop.permute.xlu0 %696  ;;  %v3260_v55 = vld [vmem:[%s2762_s30 + $0x120] sm:$0xff] }
  0xf0   : > { %4664 = vst [vmem:[#allocation65_spill] sm:$0xff] %v3231_v44 }
  0xf1   : > { %4665 = vst [vmem:[#allocation66_spill] sm:$0xff] %v3233_v50 }
  0xf2   : > { %4673 = vst [vmem:[#allocation74_spill] sm:$0xff] %v3260_v55 }
  0xf4   : > { %854 = vrot.lane.b32.xlu2 %v3239_v60, %s2675_s6  ;;  %852 = vrot.lane.b32.xlu1 %v3236_v54, %s2675_s6  ;;  %v3278_v60 = vld [vmem:[%s2762_s30 + $0x138] sm:$0xff] }
  0xf5   : > { %850 = vrot.lane.b32.xlu0 %v3242_v49, %s2675_s6  ;;  %4678 = vst [vmem:[#allocation79_spill] sm:$0xff] %v3278_v60  ;;  %v3284_v49 = vld [vmem:[%s2762_s30 + $0x128] sm:$0xff] }
  0xf6   : > { %v3250_v44 = vpop.permute.xlu2 %724  ;;  %v3252_v50 = vpop.permute.xlu1 %704  ;;  %4680 = vst [vmem:[#allocation81_spill] sm:$0xff] %v3284_v49 }
  0xf7   : > { %4669 = vst [vmem:[#allocation70_spill] sm:$0xff] %v3250_v44  ;;  %v3254_v30 = vpop.permute.xlu0 %702  ;;  %v3281_v44 = vld [vmem:[%s2762_s30 + $0x140] sm:$0xff] }
  0xf8   : > { %4670 = vst [vmem:[#allocation71_spill] sm:$0xff] %v3252_v50 }
  0xf9   : > { %4671 = vst [vmem:[#allocation72_spill] sm:$0xff] %v3254_v30 }
  0xfa   : > { %4679 = vst [vmem:[#allocation80_spill] sm:$0xff] %v3281_v44 }
  0xfc   : > { %860 = vrot.lane.b32.xlu2 %v3260_v55, %s2675_s6  ;;  %858 = vrot.lane.b32.xlu1 %v3257_v61, %s2675_s6  ;;  %v3302_v55 = vld [vmem:[%s2762_s30 + $0x168] sm:$0xff] }
  0xfd   : > { %856 = vrot.lane.b32.xlu0 %v3263_v35, %s2675_s6  ;;  %4685 = vst [vmem:[#allocation86_spill] sm:$0xff] %v3302_v55  ;;  %v3305_v35 = vld [vmem:[%s2762_s30 + $0x150] sm:$0xff] }
  0xfe   : > { %v3271_v50 = vpop.permute.xlu2 %730  ;;  %v3273_v30 = vpop.permute.xlu1 %710 }
  0xff   : > { %4675 = vst [vmem:[#allocation76_spill] sm:$0xff] %v3271_v50  ;;  %v3275_v54 = vpop.permute.xlu0 %708  ;;  %v3299_v50 = vld [vmem:[%s2762_s30 + $0x158] sm:$0xff] }
 0x100   : > { %4676 = vst [vmem:[#allocation77_spill] sm:$0xff] %v3273_v30 }
 0x101   : > { %4677 = vst [vmem:[#allocation78_spill] sm:$0xff] %v3275_v54 }
 0x102   : > { %4684 = vst [vmem:[#allocation85_spill] sm:$0xff] %v3299_v50 }
 0x104   : > { %866 = vrot.lane.b32.xlu2 %v3281_v44, %s2675_s6  ;;  %864 = vrot.lane.b32.xlu1 %v3278_v60, %s2675_s6  ;;  %v2308_v44 = vld [vmem:[%s2762_s30 + $0x188] sm:$0xff] }
 0x105   : > { %862 = vrot.lane.b32.xlu0 %v3284_v49, %s2675_s6  ;;  %v3324_v49 = vld [vmem:[%s2762_s30 + $0x170] sm:$0xff] }
 0x106   : > { %v3292_v30 = vpop.permute.xlu2 %736  ;;  %v3294_v54 = vpop.permute.xlu1 %716 }
 0x107   : > { %4681 = vst [vmem:[#allocation82_spill] sm:$0xff] %v3292_v30  ;;  %v3296_v61 = vpop.permute.xlu0 %714  ;;  %v3321_v30 = vld [vmem:[%s2762_s30 + $0x180] sm:$0xff] }
 0x108   : > { %4682 = vst [vmem:[#allocation83_spill] sm:$0xff] %v3294_v54 }
 0x109   : > { %4683 = vst [vmem:[#allocation84_spill] sm:$0xff] %v3296_v61 }
 0x10a   : > { %4688 = vst [vmem:[#allocation89_spill] sm:$0xff] %v3321_v30 }
 0x10c   : > { %872 = vrot.lane.b32.xlu2 %v3302_v55, %s2675_s6  ;;  %870 = vrot.lane.b32.xlu1 %v3299_v50, %s2675_s6 }
 0x10d   : > { %868 = vrot.lane.b32.xlu0 %v3305_v35, %s2675_s6 }
 0x10e   : > { %v3313_v60 = vpop.permute.xlu2 %742  ;;  %v3315_v54 = vpop.permute.xlu1 %722 }
 0x10f   : > { %4686 = vst [vmem:[#allocation87_spill] sm:$0xff] %v3315_v54  ;;  %v3317_v61 = vpop.permute.xlu0 %720 }
 0x110   : > { %4687 = vst [vmem:[#allocation88_spill] sm:$0xff] %v3317_v61 }
 0x114   : > { %878 = vrot.lane.b32.xlu2 %v2308_v44, %s2675_s6  ;;  %876 = vrot.lane.b32.xlu1 %v3321_v30, %s2675_s6 }
 0x115   : > { %874 = vrot.lane.b32.xlu0 %v3324_v49, %s2675_s6  ;;  %s2613_s6 = scalar_lea.hbm %s4553_s3, 512 }
 0x116   : > { %v3331_v55 = vpop.permute.xlu2 %748  ;;  %v3333_v50 = vpop.permute.xlu1 %728 }
 0x117   : > { %v3335_v54 = vpop.permute.xlu0 %726 }
 0x11c   : > { %948 = vrot.lane.b32.xlu2 %v2765_v0, %s2676_s7  ;;  %946 = vrot.lane.b32.xlu1 %v2780_v4, %s2676_s7 }
 0x11d   : > { %944 = vrot.lane.b32.xlu0 %v2768_v1, %s2676_s7 }
 0x11e   : > { %v3343_v44 = vpop.permute.xlu2 %818  ;;  %v3345_v30 = vpop.permute.xlu1 %734 }
 0x11f   : > { %v3347_v61 = vpop.permute.xlu0 %732 }
 0x124   : > { %954 = vrot.lane.b32.xlu2 %v2792_v7, %s2676_s7  ;;  %952 = vrot.lane.b32.xlu1 %v2795_v8, %s2676_s7 }
 0x125   : > { %950 = vrot.lane.b32.xlu0 %v2777_v3, %s2676_s7 }
 0x126   : > { %v3355_v0 = vpop.permute.xlu2 %824  ;;  %v3357_v4 = vpop.permute.xlu1 %740 }
 0x127   : > { %v3359_v1 = vpop.permute.xlu0 %738 }
 0x12c   : > { %960 = vrot.lane.b32.xlu2 %v2807_v10, %s2676_s7  ;;  %958 = vrot.lane.b32.xlu1 %v2810_v11, %s2676_s7 }
 0x12d   : > { %956 = vrot.lane.b32.xlu0 %v2789_v6, %s2676_s7 }
 0x12e   : > { %v3367_v7 = vpop.permute.xlu2 %830  ;;  %v3369_v8 = vpop.permute.xlu1 %746 }
 0x12f   : > { %v3371_v3 = vpop.permute.xlu0 %744 }
 0x134   : > { %966 = vrot.lane.b32.xlu2 %v2822_v13, %s2676_s7  ;;  %964 = vrot.lane.b32.xlu1 %v2825_v14, %s2676_s7 }
 0x135   : > { %962 = vrot.lane.b32.xlu0 %v2804_v9, %s2676_s7 }
 0x136   : > { %v3379_v10 = vpop.permute.xlu2 %836  ;;  %v3381_v11 = vpop.permute.xlu1 %816 }
 0x137   : > { %4689 = vst [vmem:[#allocation90_spill] sm:$0xff] %v3379_v10  ;;  %v3383_v6 = vpop.permute.xlu0 %750 }
 0x138   : > { %4690 = vst [vmem:[#allocation91_spill] sm:$0xff] %v3381_v11 }
 0x13c   : > { %972 = vrot.lane.b32.xlu2 %v2837_v16, %s2676_s7  ;;  %970 = vrot.lane.b32.xlu1 %v2840_v17, %s2676_s7 }
 0x13d   : > { %968 = vrot.lane.b32.xlu0 %v2819_v12, %s2676_s7 }
 0x13e   : > { %v3391_v13 = vpop.permute.xlu2 %842  ;;  %v3393_v14 = vpop.permute.xlu1 %822 }
 0x13f   : > { %v3395_v9 = vpop.permute.xlu0 %820 }
 0x144   : > { %978 = vrot.lane.b32.xlu2 %v2852_v19, %s2676_s7  ;;  %976 = vrot.lane.b32.xlu1 %v2855_v20, %s2676_s7 }
 0x145   : > { %974 = vrot.lane.b32.xlu0 %v2834_v15, %s2676_s7 }
 0x146   : > { %v3403_v16 = vpop.permute.xlu2 %848  ;;  %v3405_v17 = vpop.permute.xlu1 %828 }
 0x147   : > { %4691 = vst [vmem:[#allocation92_spill] sm:$0xff] %v3405_v17  ;;  %v3407_v12 = vpop.permute.xlu0 %826  ;;  %v3601_v17 = vld [vmem:[%s2762_s30 + $0x18a] sm:$0xff] }
 0x148   : > { %4692 = vst [vmem:[#allocation93_spill] sm:$0xff] %v3407_v12  ;;  %v2373_v12 = vld [vmem:[%s2762_s30 + $0x30] sm:$0xff] }
 0x14c   : > { %984 = vrot.lane.b32.xlu2 %v2867_v22, %s2676_s7  ;;  %982 = vrot.lane.b32.xlu1 %v2870_v23, %s2676_s7 }
 0x14d   : > { %980 = vrot.lane.b32.xlu0 %v2849_v18, %s2676_s7 }
 0x14e   : > { %v3415_v19 = vpop.permute.xlu2 %854  ;;  %v3417_v20 = vpop.permute.xlu1 %834 }
 0x14f   : > { %4693 = vst [vmem:[#allocation94_spill] sm:$0xff] %v3417_v20  ;;  %v3419_v15 = vpop.permute.xlu0 %832  ;;  %v3458_v20 = vld [vmem:[%s2762_s30 + $0x189] sm:$0xff] }
 0x150   : > { %4694 = vst [vmem:[#allocation95_spill] sm:$0xff] %v3419_v15  ;;  %v3461_v15 = vld [vmem:[%s2762_s30 + $0x181] sm:$0xff] }
 0x151   : > { %4698 = vst [vmem:[#allocation99_spill] sm:$0xff] %v3458_v20 }
 0x152   : > { %4699 = vst [vmem:[#allocation100_spill] sm:$0xff] %v3461_v15 }
 0x154   : > { %990 = vrot.lane.b32.xlu2 %v2882_v25, %s2676_s7  ;;  %988 = vrot.lane.b32.xlu1 %v2885_v26, %s2676_s7 }
 0x155   : > { %986 = vrot.lane.b32.xlu0 %v2864_v21, %s2676_s7 }
 0x156   : > { %v3427_v22 = vpop.permute.xlu2 %860  ;;  %v3429_v18 = vpop.permute.xlu1 %840 }
 0x157   : > { %4695 = vst [vmem:[#allocation96_spill] sm:$0xff] %v3429_v18  ;;  %v3431_v23 = vpop.permute.xlu0 %838 }
 0x158   : > { %4696 = vst [vmem:[#allocation97_spill] sm:$0xff] %v3431_v23  ;;  %v3584_v23 = vld [vmem:[%s2762_s30 + $0x182] sm:$0xff] }
 0x15c   : > { %996 = vrot.lane.b32.xlu2 %v2897_v28, %s2676_s7  ;;  %994 = vrot.lane.b32.xlu1 %v2900_v29, %s2676_s7 }
 0x15d   : > { %992 = vrot.lane.b32.xlu0 %v2879_v24, %s2676_s7 }
 0x15e   : > { %v3439_v25 = vpop.permute.xlu2 %866  ;;  %v3441_v21 = vpop.permute.xlu1 %846 }
 0x15f   : > { %v3443_v26 = vpop.permute.xlu0 %844 }
 0x164   : > { %1002 = vrot.lane.b32.xlu2 %v2910_v31, %s2676_s7  ;;  %1000 = vrot.lane.b32.xlu1 %v2913_v32, %s2676_s7 }
 0x165   : > { %998 = vrot.lane.b32.xlu0 %v2894_v27, %s2676_s7 }
 0x166   : > { %v3451_v28 = vpop.permute.xlu2 %872  ;;  %v3453_v29 = vpop.permute.xlu1 %852 }
 0x167   : > { %4697 = vst [vmem:[#allocation98_spill] sm:$0xff] %v3451_v28  ;;  %v3455_v24 = vpop.permute.xlu0 %850  ;;  %v4723_v28 = vld [vmem:[#allocation43_spill] sm:$0xff] }
 0x16c   : > { %1072 = vrot.lane.b32.xlu2 %v2924_v34, %s2677_s8  ;;  %1006 = vrot.lane.b32.xlu1 %v3458_v20, %s2676_s7 }
 0x16d   : > { %1004 = vrot.lane.b32.xlu0 %v3461_v15, %s2676_s7 }
 0x16e   : > { %v3469_v27 = vpop.permute.xlu2 %878  ;;  %v3471_v31 = vpop.permute.xlu1 %858 }
 0x16f   : > { %v3473_v32 = vpop.permute.xlu0 %856 }
 0x174   : > { %1078 = vrot.lane.b32.xlu2 %v2938_v38, %s2677_s8  ;;  %1076 = vrot.lane.b32.xlu1 %v2941_v39, %s2677_s8 }
 0x175   : > { %1074 = vrot.lane.b32.xlu0 %v2921_v33, %s2677_s8 }
 0x176   : > { %v3481_v34 = vpop.permute.xlu2 %948  ;;  %v3483_v20 = vpop.permute.xlu1 %864 }
 0x177   : > { %v3485_v15 = vpop.permute.xlu0 %862 }
 0x17c   : > { %1084 = vrot.lane.b32.xlu2 %v2955_v42, %s2677_s8  ;;  %1082 = vrot.lane.b32.xlu1 %v2958_v43, %s2677_s8 }
 0x17d   : > { %1080 = vrot.lane.b32.xlu0 %v2935_v37, %s2677_s8 }
 0x17e   : > { %v3493_v38 = vpop.permute.xlu2 %954  ;;  %v3495_v39 = vpop.permute.xlu1 %870 }
 0x17f   : > { %4700 = vst [vmem:[#allocation101_spill] sm:$0xff] %v3493_v38  ;;  %v3497_v33 = vpop.permute.xlu0 %868 }
 0x184   : > { %1090 = vrot.lane.b32.xlu2 %v2972_v46, %s2677_s8  ;;  %1088 = vrot.lane.b32.xlu1 %v2975_v47, %s2677_s8 }
 0x185   : > { %1086 = vrot.lane.b32.xlu0 %v2952_v41, %s2677_s8 }
 0x186   : > { %v3505_v42 = vpop.permute.xlu2 %960  ;;  %v3507_v43 = vpop.permute.xlu1 %876 }
 0x187   : > { %4701 = vst [vmem:[#allocation102_spill] sm:$0xff] %v3505_v42  ;;  %v3509_v37 = vpop.permute.xlu0 %874  ;;  %v4709_v42 = vld [vmem:[#allocation28_spill] sm:$0xff] }
 0x188   : > { %4712 = vst [vmem:[#allocation28_spill] sm:$0xff] %v3584_v23 }
 0x18c   : > { %1096 = vrot.lane.b32.xlu2 %v2993_v52, %s2677_s8  ;;  %1094 = vrot.lane.b32.xlu1 %v2996_v53, %s2677_s8 }
 0x18d   : > { %1092 = vrot.lane.b32.xlu0 %v2969_v45, %s2677_s8 }
 0x18e   : > { %v3517_v46 = vpop.permute.xlu2 %966  ;;  %v3519_v47 = vpop.permute.xlu1 %946 }
 0x18f   : > { %4702 = vst [vmem:[#allocation103_spill] sm:$0xff] %v3517_v46  ;;  %v3521_v41 = vpop.permute.xlu0 %944 }
 0x190   : > { %4703 = vst [vmem:[#allocation104_spill] sm:$0xff] %v3521_v41 }
 0x194   : > { %1102 = vrot.lane.b32.xlu2 %v3014_v58, %s2677_s8  ;;  %1100 = vrot.lane.b32.xlu1 %v3017_v59, %s2677_s8 }
 0x195   : > { %1098 = vrot.lane.b32.xlu0 %v2990_v51, %s2677_s8 }
 0x196   : > { %v3529_v52 = vpop.permute.xlu2 %972  ;;  %v3531_v53 = vpop.permute.xlu1 %952 }
 0x197   : > { %v3533_v45 = vpop.permute.xlu0 %950 }
 0x19c   : > { %1108 = vrot.lane.b32.xlu2 %v3035_v2, %s2677_s8  ;;  %1106 = vrot.lane.b32.xlu1 %v3038_v5, %s2677_s8 }
 0x19d   : > { %1104 = vrot.lane.b32.xlu0 %v3011_v57, %s2677_s8 }
 0x19e   : > { %v3541_v58 = vpop.permute.xlu2 %978  ;;  %v3543_v59 = vpop.permute.xlu1 %958 }
 0x19f   : > { %4704 = vst [vmem:[#allocation105_spill] sm:$0xff] %v3543_v59  ;;  %v3545_v51 = vpop.permute.xlu0 %956  ;;  %v4724_v59 = vld [vmem:[#allocation81_spill] sm:$0xff] }
 0x1a0   : > { %4705 = vst [vmem:[#allocation106_spill] sm:$0xff] %v3545_v51  ;;  %v2374_v51 = vld [vmem:[%s2762_s30 + $0x38] sm:$0xff] }
 0x1a4   : > { %1114 = vrot.lane.b32.xlu2 %v3056_v40, %s2677_s8  ;;  %1112 = vrot.lane.b32.xlu1 %v3059_v62, %s2677_s8 }
 0x1a5   : > { %1110 = vrot.lane.b32.xlu0 %v3032_v63, %s2677_s8 }
 0x1a6   : > { %v3553_v2 = vpop.permute.xlu2 %984  ;;  %v3555_v5 = vpop.permute.xlu1 %964 }
 0x1a7   : > { %4706 = vst [vmem:[#allocation107_spill] sm:$0xff] %v3555_v5  ;;  %v3557_v57 = vpop.permute.xlu0 %962  ;;  %v4718_v5 = vld [vmem:[#allocation75_spill] sm:$0xff] }
 0x1a8   : > { %4707 = vst [vmem:[#allocation108_spill] sm:$0xff] %v3557_v57 }
 0x1ac   : > { %1120 = vrot.lane.b32.xlu2 %v3077_v36, %s2677_s8  ;;  %1118 = vrot.lane.b32.xlu1 %v3080_v56, %s2677_s8  ;;  %v4710_v36 = vld [vmem:[#allocation29_spill] sm:$0xff]  ;;  %v4711_v56 = vld [vmem:[#allocation23_spill] sm:$0xff] }
 0x1ad   : > { %1116 = vrot.lane.b32.xlu0 %v3053_v48, %s2677_s8  ;;  %4716 = vst [vmem:[#allocation23_spill] sm:$0xff] %v3601_v17 }
 0x1ae   : > { %v3565_v40 = vpop.permute.xlu2 %990  ;;  %v3567_v62 = vpop.permute.xlu1 %970 }
 0x1af   : > { %v3569_v63 = vpop.permute.xlu0 %968 }
 0x1b0   : > { %4708 = vst [vmem:[#allocation109_spill] sm:$0xff] %v3569_v63  ;;  %v4713_v63 = vld [vmem:[#allocation33_spill] sm:$0xff] }
 0x1b4   : > { %1126 = vrot.lane.b32.xlu2 %v4709_v42, %s2677_s8  ;;  %1124 = vrot.lane.b32.xlu1 %v4710_v36, %s2677_s8  ;;  %v4714_v42 = vld [vmem:[#allocation27_spill] sm:$0xff] }
 0x1b5   : > { %1122 = vrot.lane.b32.xlu0 %v4711_v56, %s2677_s8 }
 0x1b6   : > { %v3577_v57 = vpop.permute.xlu2 %996  ;;  %v3579_v48 = vpop.permute.xlu1 %976 }
 0x1b7   : > { %v3581_v46 = vpop.permute.xlu0 %974 }
 0x1bc   : > { %1132 = vrot.lane.b32.xlu2 %v3584_v23, %s2677_s8  ;;  %1130 = vrot.lane.b32.xlu1 %v4713_v63, %s2677_s8  ;;  %v4717_v23 = vld [vmem:[#allocation37_spill] sm:$0xff] }
 0x1bd   : > { %1128 = vrot.lane.b32.xlu0 %v4714_v42, %s2677_s8  ;;  %v1575_v63 = vsel %vm1552_vm0, %v4718_v5, %v4717_v23  ;;  %v4720_v5 = vld [vmem:[#allocation12_spill] sm:$0xff] }
 0x1be   : > { %v3592_v18 = vpop.permute.xlu2 %1002  ;;  %v3594_v56 = vpop.permute.xlu1 %982  ;;  %v1608_v42 = vsel %vm1585_vm1, %v1575_v63, %v3347_v61  ;;  %v4722_v63 = vld [vmem:[#allocation42_spill] sm:$0xff] }
 0x1bf   : > { %4715 = vst [vmem:[#allocation29_spill] sm:$0xff] %v3592_v18  ;;  %v3596_v38 = vpop.permute.xlu0 %980  ;;  %v1641_v41 = vsel %vm1618_vm2, %v1608_v42, %v3427_v22  ;;  %v4721_v18 = vld [vmem:[#allocation35_spill] sm:$0xff]  ;;  %v1578_v22 = vsel %vm1552_vm0, %v4724_v59, %v4723_v28  ;;  %v4725_v42 = vld [vmem:[#allocation46_spill] sm:$0xff] }
 0x1c0   : > { %v1556_v61 = vsel %vm1552_vm0, %v4721_v18, %v4720_v5  ;;  %v1611_v18 = vsel %vm1585_vm1, %v1578_v22, %v3359_v1  ;;  %v4729_v28 = vld [vmem:[#allocation82_spill] sm:$0xff] }
 0x1c4   : > { %1202 = vrot.lane.b32.xlu2 %v2374_v51, %s2678_s9  ;;  %1200 = vrot.lane.b32.xlu1 %v2373_v12, %s2678_s9  ;;  %v2377_v12 = vld [vmem:[%s2762_s30 + $0x60] sm:$0xff] }
 0x1c5   : > { %1134 = vrot.lane.b32.xlu0 %v3601_v17, %s2677_s8  ;;  %v1589_v17 = vsel %vm1585_vm1, %v1556_v61, %v4722_v63  ;;  %v4728_v61 = vld [vmem:[#allocation40_spill] sm:$0xff]  ;;  %s218_s8 = sand.u32 1, %s2655_s13  }
 0x1c6   : > { %v3614_v11 = vpop.permute.xlu2 %1072  ;;  %v989_v10 = vpop.permute.xlu1 %988  ;;  %v1622_v5 = vsel %vm1618_vm2, %v1589_v17, %v3393_v14 }
 0x1c7   : > { %4719 = vst [vmem:[#allocation33_spill] sm:$0xff] %v3614_v11  ;;  %v3617_v23 = vsel %vm1651_vm3, %v1641_v41, %v989_v10  ;;  %v3619_v51 = vpop.permute.xlu0 %986  ;;  %v4726_v10 = vld [vmem:[#allocation44_spill] sm:$0xff]  ;;  %v4727_v41 = vld [vmem:[#allocation74_spill] sm:$0xff]  ;;  %v1655_v63 = vsel %vm1651_vm3, %v1622_v5, %v3533_v45  ;;  %v4730_v45 = vld [vmem:[#allocation51_spill] sm:$0xff] }
 0x1c8   : > { %v1577_v11 = vsel %vm1552_vm0, %v4727_v41, %v4726_v10  ;;  %v4732_v5 = vld [vmem:[#allocation80_spill] sm:$0xff] }
 0x1c9   : > { %v1610_v59 = vsel %vm1585_vm1, %v1577_v11, %v4729_v28  ;;  %v4733_v28 = vld [vmem:[#allocation45_spill] sm:$0xff] }
 0x1ca   : > { %v1643_v1 = vsel %vm1618_vm2, %v1610_v59, %v3483_v20 }
 0x1cc   : > { %1208 = vrot.lane.b32.xlu2 %v2377_v12, %s2678_s9  ;;  %1206 = vrot.lane.b32.xlu1 %v4725_v42, %s2678_s9  ;;  %v1644_v12 = vsel %vm1618_vm2, %v1611_v18, %v3439_v25  ;;  %v2380_v25 = vld [vmem:[%s2762_s30 + $0x80] sm:$0xff] }
 0x1cd   : > { %1204 = vrot.lane.b32.xlu0 %v4728_v61, %s2678_s9  ;;  %v4731_v18 = vld [vmem:[#allocation49_spill] sm:$0xff] }
 0x1ce   : > { %v1079_v10 = vpop.permute.xlu2 %1078  ;;  %v995_v41 = vpop.permute.xlu1 %994  ;;  %v1580_v20 = vsel %vm1552_vm0, %v4732_v5, %v4731_v18 }
 0x1cf   : > { %v3651_v14 = vsel %vm1684_vm4, %v1655_v63, %v1079_v10  ;;  %v3654_v17 = vsel %vm1651_vm3, %v1644_v12, %v995_v41  ;;  %v993_v11 = vpop.permute.xlu0 %992  ;;  %v1613_v59 = vsel %vm1585_vm1, %v1580_v20, %v3313_v60  ;;  %v4736_v60 = vld [vmem:[#allocation57_spill] sm:$0xff]  ;;  %v4737_v20 = vld [vmem:[#allocation50_spill] sm:$0xff] }
 0x1d0   : > { %v3657_v22 = vsel %vm1651_vm3, %v1643_v1, %v993_v11  ;;  %v1646_v10 = vsel %vm1618_vm2, %v1613_v59, %v3495_v39  ;;  %v2383_v11 = vld [vmem:[%s2762_s30 + $0xa8] sm:$0xff] }
 0x1d4   : > { %1214 = vrot.lane.b32.xlu2 %v2380_v25, %s2678_s9  ;;  %1212 = vrot.lane.b32.xlu1 %v4730_v45, %s2678_s9  ;;  %v4735_v25 = vld [vmem:[#allocation53_spill] sm:$0xff] }
 0x1d5   : > { %1210 = vrot.lane.b32.xlu0 %v4733_v28, %s2678_s9  ;;  %v1584_v18 = vsel %vm1552_vm0, %v3324_v49, %v4735_v25  ;;  %v4740_v25 = vld [vmem:[#allocation34_spill] sm:$0xff] }
 0x1d6   : > { %v3670_v12 = vpop.permute.xlu2 %1084  ;;  %v3672_v63 = vpop.permute.xlu1 %1000  ;;  %v1617_v5 = vsel %vm1585_vm1, %v1584_v18, %v3383_v6  ;;  %v4741_v18 = vld [vmem:[#allocation59_spill] sm:$0xff] }
 0x1d7   : > { %4734 = vst [vmem:[#allocation27_spill] sm:$0xff] %v3670_v12  ;;  %v999_v41 = vpop.permute.xlu0 %998  ;;  %v1650_v39 = vsel %vm1618_vm2, %v1617_v5, %v3469_v27  ;;  %v4742_v27 = vld [vmem:[#allocation63_spill] sm:$0xff] }
 0x1d8   : > { %v3677_v1 = vsel %vm1651_vm3, %v1646_v10, %v999_v41  ;;  %v2386_v41 = vld [vmem:[%s2762_s30 + $0xc8] sm:$0xff] }
 0x1dc   : > { %1220 = vrot.lane.b32.xlu2 %v2383_v11, %s2678_s9  ;;  %1218 = vrot.lane.b32.xlu1 %v4736_v60, %s2678_s9  ;;  %v4739_v11 = vld [vmem:[#allocation9_spill] sm:$0xff] }
 0x1dd   : > { %1216 = vrot.lane.b32.xlu0 %v4737_v20, %s2678_s9  ;;  %v1555_v6 = vsel %vm1552_vm0, %v4740_v25, %v4739_v11 }
 0x1de   : > { %v3692_v28 = vpop.permute.xlu2 %1090  ;;  %v1007_v59 = vpop.permute.xlu1 %1006  ;;  %v1588_v20 = vsel %vm1585_vm1, %v1555_v6, %v4741_v18  ;;  %v2389_v6 = vld [vmem:[%s2762_s30 + $0xf0] sm:$0xff]  ;;  %v4746_v18 = vld [vmem:[#allocation26_spill] sm:$0xff] }
 0x1df   : > { %4738 = vst [vmem:[#allocation37_spill] sm:$0xff] %v3692_v28  ;;  %v3695_v49 = vsel %vm1651_vm3, %v1650_v39, %v1007_v59  ;;  %v3697_v10 = vpop.permute.xlu0 %1004  ;;  %v1621_v5 = vsel %vm1618_vm2, %v1588_v20, %v3395_v9  ;;  %v4743_v39 = vld [vmem:[#allocation56_spill] sm:$0xff] }
 0x1e0   : > { %v1654_v59 = vsel %vm1651_vm3, %v1621_v5, %v3481_v34  ;;  %v1568_v9 = vsel %vm1552_vm0, %v4743_v39, %v4746_v18  ;;  %v4747_v20 = vld [vmem:[#allocation64_spill] sm:$0xff]  ;;  %v4748_v34 = vld [vmem:[#allocation69_spill] sm:$0xff] }
 0x1e1   : > { %v1601_v12 = vsel %vm1585_vm1, %v1568_v9, %v4747_v20  ;;  %v2429_v18 = vld [vmem:[%s2762_s30 + $0x151] sm:$0xff] }
 0x1e2   : > { %v1634_v5 = vsel %vm1618_vm2, %v1601_v12, %v3441_v21  ;;  %v2421_v9 = vld [vmem:[%s2762_s30 + $0xf1] sm:$0xff]  ;;  %v4752_v12 = vld [vmem:[#allocation70_spill] sm:$0xff] }
 0x1e3   : > { %v4751_v20 = vld [vmem:[#allocation32_spill] sm:$0xff] }
 0x1e4   : > { %1226 = vrot.lane.b32.xlu2 %v2386_v41, %s2678_s9  ;;  %1224 = vrot.lane.b32.xlu1 %v4742_v27, %s2678_s9 }
 0x1e5   : > { %1222 = vrot.lane.b32.xlu0 %v4743_v39, %s2678_s9 }
 0x1e6   : > { %v3714_v28 = vpop.permute.xlu2 %1096  ;;  %v1077_v11 = vpop.permute.xlu1 %1076 }
 0x1e7   : > { %4744 = vst [vmem:[#allocation75_spill] sm:$0xff] %v3714_v28  ;;  %v3717_v25 = vsel %vm1684_vm4, %v1654_v59, %v1077_v11  ;;  %v3719_v41 = vpop.permute.xlu0 %1074  ;;  %v4749_v59 = vld [vmem:[#allocation62_spill] sm:$0xff]  ;;  %v1667_v11 = vsel %vm1651_vm3, %v1634_v5, %v3581_v46 }
 0x1e8   : > { %4745 = vst [vmem:[#allocation12_spill] sm:$0xff] %v3717_v25  ;;  %v1571_v21 = vsel %vm1552_vm0, %v4749_v59, %v4751_v20 }
 0x1e9   : > { %v1604_v25 = vsel %vm1585_vm1, %v1571_v21, %v4752_v12  ;;  %v4755_v21 = vld [vmem:[#allocation38_spill] sm:$0xff]  ;;  %v4756_v12 = vld [vmem:[#allocation68_spill] sm:$0xff] }
 0x1ea   : > { %v1637_v46 = vsel %vm1618_vm2, %v1604_v25, %v3453_v29  ;;  %v1574_v29 = vsel %vm1552_vm0, %v4756_v12, %v4755_v21  ;;  %v4757_v25 = vld [vmem:[#allocation76_spill] sm:$0xff] }
 0x1ec   : > { %1232 = vrot.lane.b32.xlu2 %v2389_v6, %s2678_s9  ;;  %1230 = vrot.lane.b32.xlu1 %v4748_v34, %s2678_s9 }
 0x1ed   : > { %1228 = vrot.lane.b32.xlu0 %v4749_v59, %s2678_s9 }
 0x1ee   : > { %v1103_v28 = vpop.permute.xlu2 %1102  ;;  %v3736_v61 = vpop.permute.xlu1 %1082 }
 0x1ef   : > { %v3739_v39 = vsel %vm1684_vm4, %v1667_v11, %v1103_v28  ;;  %v3741_v6 = vpop.permute.xlu0 %1080  ;;  %v1670_v28 = vsel %vm1651_vm3, %v1637_v46, %v3596_v38 }
 0x1f0   : > { %4750 = vst [vmem:[#allocation35_spill] sm:$0xff] %v3739_v39  ;;  %v1607_v39 = vsel %vm1585_vm1, %v1574_v29, %v4757_v25  ;;  %v4758_v25 = vld [vmem:[#allocation11_spill] sm:$0xff] }
 0x1f1   : > { %v1640_v38 = vsel %vm1618_vm2, %v1607_v39, %v3471_v31  ;;  %v4761_v39 = vld [vmem:[#allocation83_spill] sm:$0xff] }
 0x1f2   : > { %v1673_v46 = vsel %vm1651_vm3, %v1640_v38, %v3619_v51  ;;  %v4763_v38 = vld [vmem:[#allocation84_spill] sm:$0xff] }
 0x1f4   : > { %1376 = vrot.lane.b32.xlu2 %v2429_v18, %s2679_s10  ;;  %1360 = vrot.lane.b32.xlu1 %v2421_v9, %s2679_s10  ;;  %v2405_v18 = vld [vmem:[%s2762_s30 + $0x31] sm:$0xff] }
 0x1f5   : > { %1248 = vrot.lane.b32.xlu0 %v3305_v35, %s2678_s9  ;;  %v2453_v9 = vld [vmem:[%s2762_s30 + $0xf2] sm:$0xff] }
 0x1f6   : > { %v1109_v5 = vpop.permute.xlu2 %1108  ;;  %v3758_v11 = vpop.permute.xlu1 %1088 }
 0x1f7   : > { %4753 = vst [vmem:[#allocation42_spill] sm:$0xff] %v3758_v11  ;;  %v3761_v59 = vsel %vm1684_vm4, %v1670_v28, %v1109_v5  ;;  %v3763_v20 = vpop.permute.xlu0 %1086  ;;  %v4760_v11 = vld [vmem:[#allocation21_spill] sm:$0xff] }
 0x1f8   : > { %4754 = vst [vmem:[#allocation43_spill] sm:$0xff] %v3761_v59  ;;  %v4759_v59 = vld [vmem:[#allocation55_spill] sm:$0xff]  ;;  %v1566_v31 = vsel %vm1552_vm0, %v4736_v60, %v4760_v11 }
 0x1fc   : > { %1328 = vrot.lane.b32.xlu2 %v2405_v18, %s2679_s10  ;;  %1504 = vrot.lane.b32.xlu1 %v4710_v36, %s2680_s11  ;;  %v2413_v18 = vld [vmem:[%s2762_s30 + $0x91] sm:$0xff]  ;;  %v1567_v36 = vsel %vm1552_vm0, %v4759_v59, %v4758_v25 }
 0x1fd   : > { %1488 = vrot.lane.b32.xlu0 %v2453_v9, %s2680_s11  ;;  %v1600_v51 = vsel %vm1585_vm1, %v1567_v36, %v4761_v39  ;;  %v4762_v9 = vld [vmem:[#allocation85_spill] sm:$0xff]  ;;  %v2445_v39 = vld [vmem:[%s2762_s30 + $0x92] sm:$0xff] }
 0x1fe   : > { %v1115_v28 = vpop.permute.xlu2 %1114  ;;  %v3780_v5 = vpop.permute.xlu1 %1094  ;;  %v1633_v59 = vsel %vm1618_vm2, %v1600_v51, %v3443_v26  ;;  %v2437_v51 = vld [vmem:[%s2762_s30 + $0x32] sm:$0xff] }
 0x1ff   : > { %v3783_v21 = vsel %vm1684_vm4, %v1673_v46, %v1115_v28  ;;  %v3785_v29 = vpop.permute.xlu0 %1092  ;;  %v1599_v46 = vsel %vm1585_vm1, %v1566_v31, %v4763_v38  ;;  %v1666_v11 = vsel %vm1651_vm3, %v1633_v59, %v3529_v52  ;;  %v4764_v52 = vld [vmem:[#allocation14_spill] sm:$0xff]  ;;  %v4765_v38 = vld [vmem:[#allocation61_spill] sm:$0xff] }
 0x200   : > { %v1632_v60 = vsel %vm1618_vm2, %v1599_v46, %v3391_v13  ;;  %v2422_v13 = vld [vmem:[%s2762_s30 + $0xf9] sm:$0xff]  ;;  %v1570_v46 = vsel %vm1552_vm0, %v4765_v38, %v4764_v52 }
 0x201   : > { %v1665_v36 = vsel %vm1651_vm3, %v1632_v60, %v3567_v62  ;;  %v4766_v59 = vld [vmem:[#allocation25_spill] sm:$0xff] }
 0x202   : > { %v1569_v62 = vsel %vm1552_vm0, %v4742_v27, %v4766_v59  ;;  %v2430_v59 = vld [vmem:[%s2762_s30 + $0x159] sm:$0xff] }
 0x204   : > { %1250 = vrot.lane.b32.xlu2 %v4762_v9, %s2678_s9  ;;  %1234 = vrot.lane.b32.xlu1 %v4756_v12, %s2678_s9 }
 0x205   : > { %1344 = vrot.lane.b32.xlu0 %v2413_v18, %s2679_s10 }
 0x206   : > { %v1121_v28 = vpop.permute.xlu2 %1120  ;;  %v1101_v25 = vpop.permute.xlu1 %1100 }
 0x207   : > { %v3813_v12 = vsel %vm1684_vm4, %v3657_v22, %v1121_v28  ;;  %v3816_v31 = vsel %vm1684_vm4, %v1666_v11, %v1101_v25  ;;  %v1099_v26 = vpop.permute.xlu0 %1098  ;;  %v4767_v22 = vld [vmem:[#allocation87_spill] sm:$0xff]  ;;  %v4768_v11 = vld [vmem:[#allocation88_spill] sm:$0xff] }
 0x208   : > { %v3819_v18 = vsel %vm1684_vm4, %v1665_v36, %v1099_v26  ;;  %v1603_v60 = vsel %vm1585_vm1, %v1570_v46, %v4767_v22  ;;  %v1602_v28 = vsel %vm1585_vm1, %v1569_v62, %v4768_v11  ;;  %v2454_v46 = vld [vmem:[%s2762_s30 + $0xfa] sm:$0xff]  ;;  %v4770_v62 = vld [vmem:[#allocation67_spill] sm:$0xff] }
 0x209   : > { %v1636_v25 = vsel %vm1618_vm2, %v1603_v60, %v3455_v24  ;;  %v1635_v27 = vsel %vm1618_vm2, %v1602_v28, %v3403_v16  ;;  %v2462_v16 = vld [vmem:[%s2762_s30 + $0x15a] sm:$0xff]  ;;  %v4771_v60 = vld [vmem:[#allocation54_spill] sm:$0xff]  ;;  %v4773_v11 = vld [vmem:[#allocation31_spill] sm:$0xff] }
 0x20a   : > { %v1669_v36 = vsel %vm1651_vm3, %v1636_v25, %v3541_v58  ;;  %v4769_v58 = vld [vmem:[#allocation17_spill] sm:$0xff]  ;;  %v1572_v28 = vsel %vm1552_vm0, %v4748_v34, %v4773_v11 }
 0x20b   : > { %v1573_v22 = vsel %vm1552_vm0, %v4770_v62, %v4769_v58  ;;  %v4774_v58 = vld [vmem:[#allocation13_spill] sm:$0xff] }
 0x20c   : > { %1362 = vrot.lane.b32.xlu2 %v2422_v13, %s2679_s10  ;;  %1472 = vrot.lane.b32.xlu1 %v2445_v39, %s2680_s11  ;;  %v1668_v13 = vsel %vm1651_vm3, %v1635_v27, %v3579_v48  ;;  %v4772_v48 = vld [vmem:[#allocation86_spill] sm:$0xff]  ;;  %v1606_v27 = vsel %vm1585_vm1, %v1573_v22, %v3333_v50  ;;  %v2406_v62 = vld [vmem:[%s2762_s30 + $0x39] sm:$0xff] }
 0x20d   : > { %1456 = vrot.lane.b32.xlu0 %v2437_v51, %s2680_s11  ;;  %v4775_v22 = vld [vmem:[#allocation20_spill] sm:$0xff] }
 0x20e   : > { %v1127_v26 = vpop.permute.xlu2 %1126  ;;  %v1107_v52 = vpop.permute.xlu1 %1106 }
 0x20f   : > { %v3847_v39 = vsel %vm1684_vm4, %v3677_v1, %v1127_v26  ;;  %v3850_v38 = vsel %vm1684_vm4, %v1669_v36, %v1107_v52  ;;  %v1105_v24 = vpop.permute.xlu0 %1104  ;;  %v1583_v1 = vsel %vm1552_vm0, %v4772_v48, %v4771_v60  ;;  %v1605_v36 = vsel %vm1585_vm1, %v1572_v28, %v3335_v54  ;;  %v4776_v60 = vld [vmem:[#allocation73_spill] sm:$0xff] }
 0x210   : > { %v3853_v51 = vsel %vm1684_vm4, %v1668_v13, %v1105_v24  ;;  %v1616_v25 = vsel %vm1585_vm1, %v1583_v1, %v3331_v55  ;;  %v1639_v26 = vsel %vm1618_vm2, %v1606_v27, %v3473_v32  ;;  %v1638_v50 = vsel %vm1618_vm2, %v1605_v36, %v3415_v19  ;;  %v239_v24 = vld [vmem:[%s2762_s30 + $0x8] sm:$0xff]  ;;  %v4777_v1 = vld [vmem:[#allocation60_spill] sm:$0xff] }
 0x211   : > { %v1649_v34 = vsel %vm1618_vm2, %v1616_v25, %v3507_v43  ;;  %v1672_v55 = vsel %vm1651_vm3, %v1639_v26, %v3553_v2  ;;  %v1671_v32 = vsel %vm1651_vm3, %v1638_v50, %v3594_v56  ;;  %v2391_v2 = vld [vmem:[%s2762_s30 + $0x108] sm:$0xff]  ;;  %v1576_v56 = vsel %vm1552_vm0, %v4776_v60, %v4775_v22 }
 0x212   : > { %v1682_v52 = vsel %vm1651_vm3, %v1649_v34, %v3697_v10  ;;  %v1554_v10 = vsel %vm1552_vm0, %v239_v24, %v4774_v58  ;;  %v1609_v25 = vsel %vm1585_vm1, %v1576_v56, %v3345_v30 }
 0x213   : > { %v1587_v11 = vsel %vm1585_vm1, %v1554_v10, %v4777_v1  ;;  %v1642_v27 = vsel %vm1618_vm2, %v1609_v25, %v3485_v15  ;;  %v4784_v25 = vld [vmem:[#allocation30_spill] sm:$0xff] }
 0x214   : > { %1506 = vrot.lane.b32.xlu2 %v2462_v16, %s2680_s11  ;;  %1490 = vrot.lane.b32.xlu1 %v2454_v46, %s2680_s11  ;;  %v1620_v28 = vsel %vm1618_vm2, %v1587_v11, %v3343_v44  ;;  %v1675_v44 = vsel %vm1651_vm3, %v1642_v27, %v3565_v40  ;;  %v4779_v40 = vld [vmem:[#allocation41_spill] sm:$0xff]  ;;  %v2431_v11 = vld [vmem:[%s2762_s30 + $0x169] sm:$0xff]  ;;  %v1582_v27 = vsel %vm1552_vm0, %v4762_v9, %v4784_v25 }
 0x215   : > { %1378 = vrot.lane.b32.xlu0 %v2430_v59, %s2679_s10  ;;  %v2414_v59 = vld [vmem:[%s2762_s30 + $0x99] sm:$0xff]  ;;  %v1653_v36 = vsel %vm1651_vm3, %v1620_v28, %v3519_v47  ;;  %v4783_v28 = vld [vmem:[#allocation15_spill] sm:$0xff] }
 0x216   : > { %v1133_v54 = vpop.permute.xlu2 %1132  ;;  %v1113_v13 = vpop.permute.xlu1 %1112  ;;  %v1686_v30 = vsel %vm1684_vm4, %v1653_v36, %v3719_v41  ;;  %v4780_v41 = vld [vmem:[#allocation24_spill] sm:$0xff] }
 0x217   : > { %v3890_v43 = vsel %vm1684_vm4, %v1682_v52, %v1133_v54  ;;  %v3893_v16 = vsel %vm1684_vm4, %v1672_v55, %v1113_v13  ;;  %v1111_v46 = vpop.permute.xlu0 %1110  ;;  %v2446_v52 = vld [vmem:[%s2762_s30 + $0x9a] sm:$0xff] }
 0x218   : > { %v3896_v19 = vsel %vm1684_vm4, %v1671_v32, %v1111_v46  ;;  %v2438_v54 = vld [vmem:[%s2762_s30 + $0x3a] sm:$0xff]  ;;  %v4781_v32 = vld [vmem:[#allocation79_spill] sm:$0xff] }
 0x219   : > { %v4778_v13 = vld [vmem:[#allocation5_spill] sm:$0xff]  ;;  %v1579_v46 = vsel %vm1552_vm0, %v4781_v32, %v4780_v41  ;;  %v4785_v36 = vld [vmem:[#allocation72_spill] sm:$0xff] }
 0x21a   : > { %v1557_v24 = vsel %vm1552_vm0, %v4779_v40, %v4778_v13 }
 0x21c   : > { %1236 = vrot.lane.b32.xlu2 %v2391_v2, %s2678_s9  ;;  %1346 = vrot.lane.b32.xlu1 %v2414_v59, %s2679_s10  ;;  %v4782_v2 = vld [vmem:[#allocation66_spill] sm:$0xff] }
 0x21d   : > { %1330 = vrot.lane.b32.xlu0 %v2406_v62, %s2679_s10  ;;  %v1590_v59 = vsel %vm1585_vm1, %v1557_v24, %v4782_v2  ;;  %v238_v24 = vld [vmem:[%s2762_s30] sm:$0xff] }
 0x21e   : > { %v1203_v26 = vpop.permute.xlu2 %1202  ;;  %v1119_v34 = vpop.permute.xlu1 %1118  ;;  %v1623_v58 = vsel %vm1618_vm2, %v1590_v59, %v3355_v0  ;;  %v2415_v59 = vld [vmem:[%s2762_s30 + $0xa9] sm:$0xff] }
 0x21f   : > { %v3924_v50 = vsel %vm1717_vm5, %v1686_v30, %v1203_v26  ;;  %v3927_v55 = vsel %vm1684_vm4, %v1675_v44, %v1119_v34  ;;  %v1117_v15 = vpop.permute.xlu0 %1116  ;;  %v1656_v62 = vsel %vm1651_vm3, %v1623_v58, %v3531_v53  ;;  %v4786_v30 = vld [vmem:[#allocation48_spill] sm:$0xff]  ;;  %v1615_v34 = vsel %vm1585_vm1, %v1582_v27, %v3369_v8  ;;  %v2407_v58 = vld [vmem:[%s2762_s30 + $0x49] sm:$0xff]  ;;  %v4798_v27 = vld [vmem:[#allocation33_spill] sm:$0xff] }
 0x220   : > { %v3931_v47 = vsel %vm1684_vm4, %v3617_v23, %v1117_v15  ;;  %v1612_v23 = vsel %vm1585_vm1, %v1579_v46, %v3357_v4  ;;  %v1689_v4 = vsel %vm1684_vm4, %v1656_v62, %v3741_v6  ;;  %v2423_v6 = vld [vmem:[%s2762_s30 + $0x109] sm:$0xff]  ;;  %v1648_v9 = vsel %vm1618_vm2, %v1615_v34, %v3509_v37  ;;  %v4787_v15 = vld [vmem:[#allocation105_spill] sm:$0xff] }
 0x221   : > { %v1645_v10 = vsel %vm1618_vm2, %v1612_v23, %v3497_v33  ;;  %v4790_v23 = vld [vmem:[#allocation10_spill] sm:$0xff] }
 0x222   : > { %v1678_v0 = vsel %vm1651_vm3, %v1645_v10, %v3577_v57  ;;  %v1560_v57 = vsel %vm1552_vm0, %v4725_v42, %v4783_v28  ;;  %v4791_v10 = vld [vmem:[#allocation18_spill] sm:$0xff] }
 0x223   : > { %v1593_v44 = vsel %vm1585_vm1, %v1560_v57, %v4785_v36  ;;  %v1563_v62 = vsel %vm1552_vm0, %v4730_v45, %v4791_v10  ;;  %v4796_v45 = vld [vmem:[#allocation104_spill] sm:$0xff]  ;;  %v4804_v10 = vld [vmem:[#allocation47_spill] sm:$0xff] }
 0x224   : > { %1474 = vrot.lane.b32.xlu2 %v2446_v52, %s2680_s11  ;;  %1458 = vrot.lane.b32.xlu1 %v2438_v54, %s2680_s11  ;;  %v1626_v26 = vsel %vm1618_vm2, %v1593_v44, %v3367_v7  ;;  %v4788_v7 = vld [vmem:[#allocation98_spill] sm:$0xff]  ;;  %v4789_v52 = vld [vmem:[#allocation29_spill] sm:$0xff] }
 0x225   : > { %1252 = vrot.lane.b32.xlu0 %v4772_v48, %s2678_s9  ;;  %v2455_v48 = vld [vmem:[%s2762_s30 + $0x10a] sm:$0xff]  ;;  %v1681_v54 = vsel %vm1651_vm3, %v1648_v9, %v4789_v52 }
 0x226   : > { %v1209_v22 = vpop.permute.xlu2 %1208  ;;  %v1125_v60 = vpop.permute.xlu1 %1124 }
 0x227   : > { %v3960_v56 = vsel %vm1717_vm5, %v1689_v4, %v1209_v22  ;;  %v3963_v1 = vsel %vm1684_vm4, %v1678_v0, %v1125_v60  ;;  %v1123_v33 = vpop.permute.xlu0 %1122  ;;  %v4792_v0 = vld [vmem:[#allocation36_spill] sm:$0xff]  ;;  %v4793_v22 = vld [vmem:[#allocation78_spill] sm:$0xff] }
 0x228   : > { %v3967_v53 = vsel %vm1684_vm4, %v3654_v17, %v1123_v33  ;;  %v1581_v17 = vsel %vm1552_vm0, %v3305_v35, %v4786_v30  ;;  %v1659_v35 = vsel %vm1651_vm3, %v1626_v26, %v4787_v15  ;;  %v1596_v60 = vsel %vm1585_vm1, %v1563_v62, %v4793_v22  ;;  %v4794_v33 = vld [vmem:[#allocation90_spill] sm:$0xff]  ;;  %v4805_v62 = vld [vmem:[#allocation65_spill] sm:$0xff] }
 0x229   : > { %v1614_v42 = vsel %vm1585_vm1, %v1581_v17, %v3371_v3  ;;  %v1692_v13 = vsel %vm1684_vm4, %v1659_v35, %v3763_v20  ;;  %v1553_v20 = vsel %vm1552_vm0, %v238_v24, %v4790_v23  ;;  %v2439_v15 = vld [vmem:[%s2762_s30 + $0x4a] sm:$0xff]  ;;  %v4807_v22 = vld [vmem:[#allocation93_spill] sm:$0xff] }
 0x22a   : > { %v1647_v8 = vsel %vm1618_vm2, %v1614_v42, %v4788_v7  ;;  %v1586_v4 = vsel %vm1585_vm1, %v1553_v20, %v4792_v0  ;;  %v2400_v35 = vld [vmem:[%s2762_s30 + $0x170] sm:$0xff]  ;;  %v4802_v23 = vld [vmem:[#allocation6_spill] sm:$0xff]  ;;  %v4806_v0 = vld [vmem:[#allocation92_spill] sm:$0xff] }
 0x22b   : > { %v1680_v37 = vsel %vm1651_vm3, %v1647_v8, %v3672_v63  ;;  %v2463_v63 = vld [vmem:[%s2762_s30 + $0x16a] sm:$0xff] }
 0x22c   : > { %1492 = vrot.lane.b32.xlu2 %v2455_v48, %s2680_s11  ;;  %1380 = vrot.lane.b32.xlu1 %v2431_v11, %s2679_s10  ;;  %v1629_v48 = vsel %vm1618_vm2, %v1596_v60, %v4794_v33  ;;  %v4795_v11 = vld [vmem:[#allocation91_spill] sm:$0xff]  ;;  %v4808_v33 = vld [vmem:[#allocation106_spill] sm:$0xff] }
 0x22d   : > { %1364 = vrot.lane.b32.xlu0 %v2423_v6, %s2679_s10  ;;  %v1619_v28 = vsel %vm1618_vm2, %v1586_v4, %v4795_v11  ;;  %v4797_v6 = vld [vmem:[#allocation107_spill] sm:$0xff]  ;;  %v4809_v11 = vld [vmem:[#allocation101_spill] sm:$0xff] }
 0x22e   : > { %v1215_v3 = vpop.permute.xlu2 %1214  ;;  %v1131_v40 = vpop.permute.xlu1 %1130  ;;  %v1652_v57 = vsel %vm1651_vm3, %v1619_v28, %v4796_v45  ;;  %v1662_v25 = vsel %vm1651_vm3, %v1629_v48, %v4797_v6  ;;  %v2392_v7 = vld [vmem:[%s2762_s30 + $0x110] sm:$0xff] }
 0x22f   : > { %v4006_v41 = vsel %vm1717_vm5, %v1692_v13, %v1215_v3  ;;  %v4009_v32 = vsel %vm1684_vm4, %v1681_v54, %v1131_v40  ;;  %v1129_v46 = vpop.permute.xlu0 %1128  ;;  %v1685_v36 = vsel %vm1684_vm4, %v1652_v57, %v4798_v27  ;;  %v1695_v44 = vsel %vm1684_vm4, %v1662_v25, %v3785_v29  ;;  %v4799_v13 = vld [vmem:[#allocation12_spill] sm:$0xff]  ;;  %v4803_v20 = vld [vmem:[#allocation39_spill] sm:$0xff] }
 0x230   : > { %v4012_v2 = vsel %vm1684_vm4, %v1680_v37, %v1129_v46  ;;  %v2432_v40 = vld [vmem:[%s2762_s30 + $0x171] sm:$0xff] }
 0x231   : > { %v2424_v24 = vld [vmem:[%s2762_s30 + $0x111] sm:$0xff] }
 0x232   : > { %v4800_v37 = vld [vmem:[#allocation16_spill] sm:$0xff]  ;;  %v4810_v45 = vld [vmem:[#allocation27_spill] sm:$0xff] }
 0x233   : > { %v4801_v46 = vld [vmem:[#allocation40_spill] sm:$0xff] }
 0x234   : > { %1348 = vrot.lane.b32.xlu2 %v2415_v59, %s2679_s10  ;;  %1332 = vrot.lane.b32.xlu1 %v2407_v58, %s2679_s10  ;;  %v1559_v59 = vsel %vm1552_vm0, %v4801_v46, %v4800_v37  ;;  %v2447_v58 = vld [vmem:[%s2762_s30 + $0xaa] sm:$0xff] }
 0x235   : > { %1508 = vrot.lane.b32.xlu0 %v2463_v63, %s2680_s11  ;;  %v2589_v37 = vld [vmem:[%s2762_s30 + $0x90] sm:$0xff]  ;;  %v4811_v46 = vld [vmem:[#allocation22_spill] sm:$0xff] }
 0x236   : > { %v1221_v30 = vpop.permute.xlu2 %1220  ;;  %v1201_v17 = vpop.permute.xlu1 %1200 }
 0x237   : > { %v4042_v26 = vsel %vm1717_vm5, %v1695_v44, %v1221_v30  ;;  %v4045_v34 = vsel %vm1717_vm5, %v1685_v36, %v1201_v17  ;;  %v1135_v42 = vpop.permute.xlu0 %1134  ;;  %v1820_v30 = vld [vmem:[%s4551_s1 + $0x20] sm:$0xf] }
 0x238   : > { %v4049_v9 = vsel %vm1684_vm4, %v3695_v49, %v1135_v42  ;;  %2509 = vmatpush.msk.msra.mxu2 %vm1922_vm6, %v1820_v30  ;;  %2510 = vmatpush.msk.msra.mxu3 %vm1922_vm6, %v1820_v30  ;;  %v1819_v42 = vld [vmem:[%s4551_s1 + $0x18] sm:$0xff] }
 0x239   : > { %2469 = vmatpush.msk.msra.mxu0 %vm1922_vm6, %v1820_v30  ;;  %2508 = vmatpush.msk.msra.mxu1 %vm1922_vm6, %v1820_v30 }
 0x23a   : > { %2512 = vmatpush.msra.mxu2 %v1819_v42  ;;  %2513 = vmatpush.msra.mxu3 %v1819_v42 }
 0x23b   : > { %1938 = vmatpush.msra.mxu0 %v1819_v42  ;;  %2511 = vmatpush.msra.mxu1 %v1819_v42 }
 0x23c   : > { %1460 = vrot.lane.b32.xlu2 %v2439_v15, %s2680_s11  ;;  %1254 = vrot.lane.b32.xlu1 %v2400_v35, %s2678_s9  ;;  %v2408_v15 = vld [vmem:[%s2762_s30 + $0x51] sm:$0xff] }
 0x23d   : > { %1238 = vrot.lane.b32.xlu0 %v2392_v7, %s2678_s9  ;;  %v2456_v35 = vld [vmem:[%s2762_s30 + $0x112] sm:$0xff] }
 0x23e   : > { %v1227_v29 = vpop.permute.xlu2 %1226  ;;  %v1207_v8 = vpop.permute.xlu1 %1206  ;;  %v1818_v7 = vld [vmem:[%s4551_s1 + $0x10] sm:$0xff] }
 0x23f   : > { %v4059_v52 = vsel %vm1717_vm5, %v3819_v18, %v1227_v29  ;;  %v4063_v49 = vsel %vm1717_vm5, %v3651_v14, %v1207_v8  ;;  %v1205_v54 = vpop.permute.xlu0 %1204  ;;  %v1558_v18 = vsel %vm1552_vm0, %v4803_v20, %v4802_v23  ;;  %v1592_v14 = vsel %vm1585_vm1, %v1559_v59, %v4804_v10  ;;  %2515 = vmatpush.msra.mxu2 %v1818_v7  ;;  %v1817_v29 = vld [vmem:[%s4551_s1 + $0x8] sm:$0xff]  ;;  %v2590_v23 = vld [vmem:[%s2762_s30 + $0x80] sm:$0xff]  ;;  %v4812_v20 = vld [vmem:[#allocation8_spill] sm:$0xff] }
 0x240   : > { %v4067_v3 = vsel %vm1717_vm5, %v4799_v13, %v1205_v54  ;;  %v1591_v63 = vsel %vm1585_vm1, %v1558_v18, %v4805_v62  ;;  %v1625_v4 = vsel %vm1618_vm2, %v1592_v14, %v4806_v0  ;;  %2516 = vmatpush.msra.mxu3 %v1818_v7  ;;  %1939 = vmatpush.msra.mxu0 %v1818_v7  ;;  %v4813_v10 = vld [vmem:[#allocation58_spill] sm:$0xff]  ;;  %v4814_v62 = vld [vmem:[#allocation77_spill] sm:$0xff]  ;;  %v4815_v0 = vld [vmem:[#allocation96_spill] sm:$0xff] }
 0x241   : > { %v1624_v60 = vsel %vm1618_vm2, %v1591_v63, %v4807_v22  ;;  %v1658_v48 = vsel %vm1651_vm3, %v1625_v4, %v4808_v33  ;;  %2518 = vmatpush.msra.mxu2 %v1817_v29  ;;  %2514 = vmatpush.msra.mxu1 %v1818_v7  ;;  %v1565_v59 = vsel %vm1552_vm0, %v2589_v37, %v4811_v46  ;;  %v4816_v22 = vld [vmem:[#allocation89_spill] sm:$0xff]  ;;  %v2448_v7 = vld [vmem:[%s2762_s30 + $0xb2] sm:$0xff] }
 0x242   : > { %v1657_v28 = vsel %vm1651_vm3, %v1624_v60, %v4809_v11  ;;  %v1691_v57 = vsel %vm1684_vm4, %v1658_v48, %v4810_v45  ;;  %2519 = vmatpush.msra.mxu3 %v1817_v29  ;;  %1940 = vmatpush.msra.mxu0 %v1817_v29  ;;  %v1564_v18 = vsel %vm1552_vm0, %v2590_v23, %v4812_v20  ;;  %v4817_v60 = vld [vmem:[#allocation97_spill] sm:$0xff]  ;;  %v4822_v23 = vld [vmem:[#allocation28_spill] sm:$0xff] }
 0x243   : > { %v1690_v27 = vsel %vm1684_vm4, %v1657_v28, %v3736_v61  ;;  %v2464_v61 = vld [vmem:[%s2762_s30 + $0x172] sm:$0xff]  ;;  %2517 = vmatpush.msra.mxu1 %v1817_v29  ;;  %v1598_v14 = vsel %vm1585_vm1, %v1565_v59, %v4813_v10  ;;  %v1597_v63 = vsel %vm1585_vm1, %v1564_v18, %v4814_v62  ;;  %v4818_v48 = vld [vmem:[#allocation109_spill] sm:$0xff]  ;;  %v2394_v62 = vld [vmem:[%s2762_s30 + $0x128] sm:$0xff] }
 0x244   : > { %1382 = vrot.lane.b32.xlu2 %v2432_v40, %s2679_s10  ;;  %1366 = vrot.lane.b32.xlu1 %v2424_v24, %s2679_s10  ;;  %v1816_v40 = vld [vmem:[%s4551_s1] sm:$0xff]  ;;  %v1631_v4 = vsel %vm1618_vm2, %v1598_v14, %v4815_v0  ;;  %v1630_v33 = vsel %vm1618_vm2, %v1597_v63, %v4817_v60  ;;  %v4819_v28 = vld [vmem:[#allocation103_spill] sm:$0xff]  ;;  %v4823_v20 = vld [vmem:[#allocation100_spill] sm:$0xff] }
 0x245   : > { %1476 = vrot.lane.b32.xlu0 %v2447_v58, %s2680_s11  ;;  %v2393_v24 = vld [vmem:[%s2762_s30 + $0x120] sm:$0xff]  ;;  %2521 = vmatpush.msra.mxu2 %v1816_v40  ;;  %v2416_v58 = vld [vmem:[%s2762_s30 + $0xb1] sm:$0xff]  ;;  %v1664_v11 = vsel %vm1651_vm3, %v1631_v4, %v4818_v48  ;;  %v1663_v45 = vsel %vm1651_vm3, %v1630_v33, %v4819_v28 }
 0x246   : > { %v4095_v6 = vpop.permute.xlu2 %1232  ;;  %v1213_v25 = vpop.permute.xlu1 %1212  ;;  %2522 = vmatpush.msra.mxu3 %v1816_v40  ;;  %1941 = vmatpush.msra.mxu0 %v1816_v40  ;;  %v1696_v30 = vsel %vm1684_vm4, %v1663_v45, %v3780_v5  ;;  %v2440_v29 = vld [vmem:[%s2762_s30 + $0x52] sm:$0xff]  ;;  %v2417_v63 = vld [vmem:[%s2762_s30 + $0xc1] sm:$0xff] }
 0x247   : > { %v4100_v36 = vsel %vm1717_vm5, %v1691_v57, %v1213_v25  ;;  %v1211_v44 = vpop.permute.xlu0 %1210  ;;  %2520 = vmatpush.msra.mxu1 %v1816_v40  ;;  %v4820_v57 = vld [vmem:[#allocation75_spill] sm:$0xff]  ;;  %v2409_v0 = vld [vmem:[%s2762_s30 + $0x61] sm:$0xff] }
 0x248   : > { %v4106_v17 = vsel %vm1717_vm5, %v1690_v27, %v1211_v44  ;;  %v1697_v25 = vsel %vm1684_vm4, %v1664_v11, %v4820_v57  ;;  %v2402_v45 = vld [vmem:[%s2762_s30 + $0x188] sm:$0xff] }
 0x24c   : > { %1334 = vrot.lane.b32.xlu2 %v2408_v15, %s2679_s10  ;;  %1510 = vrot.lane.b32.xlu1 %v2464_v61, %s2680_s11 }
 0x24d   : > { %1494 = vrot.lane.b32.xlu0 %v2456_v35, %s2680_s11  ;;  %v2425_v35 = vld [vmem:[%s2762_s30 + $0x121] sm:$0xff] }
 0x24e   : > { %v4123_v8 = vpop.permute.xlu2 %1376  ;;  %v4125_v54 = vpop.permute.xlu1 %1218 }
 0x24f   : > { %v4127_v13 = vpop.permute.xlu0 %1216 }
 0x254   : > { %1256 = vrot.lane.b32.xlu2 %v4816_v22, %s2678_s9  ;;  %1240 = vrot.lane.b32.xlu1 %v2393_v24, %s2678_s9  ;;  %v4821_v24 = vld [vmem:[#allocation35_spill] sm:$0xff] }
 0x255   : > { %1350 = vrot.lane.b32.xlu0 %v2416_v58, %s2679_s10  ;;  %v2457_v58 = vld [vmem:[%s2762_s30 + $0x122] sm:$0xff] }
 0x256   : > { %v4158_v27 = vpop.permute.xlu2 %1328  ;;  %v1225_v44 = vpop.permute.xlu1 %1224 }
 0x257   : > { %v4163_v42 = vsel %vm1717_vm5, %v1697_v25, %v1225_v44  ;;  %v1223_v15 = vpop.permute.xlu0 %1222  ;;  %v2591_v44 = vld [vmem:[%s2762_s30 + $0x60] sm:$0xff] }
 0x258   : > { %v4166_v61 = vsel %vm1717_vm5, %v1696_v30, %v1223_v15  ;;  %v4824_v30 = vld [vmem:[#allocation7_spill] sm:$0xff] }
 0x259   : > { %v1561_v15 = vsel %vm1552_vm0, %v2591_v44, %v4824_v30  ;;  %v4831_v44 = vld [vmem:[#allocation19_spill] sm:$0xff] }
 0x25c   : > { %1368 = vrot.lane.b32.xlu2 %v2425_v35, %s2679_s10  ;;  %1478 = vrot.lane.b32.xlu1 %v2448_v7, %s2680_s11  ;;  %v4825_v35 = vld [vmem:[#allocation71_spill] sm:$0xff] }
 0x25d   : > { %1462 = vrot.lane.b32.xlu0 %v2440_v29, %s2680_s11  ;;  %v1594_v7 = vsel %vm1585_vm1, %v1561_v15, %v4825_v35  ;;  %v2458_v29 = vld [vmem:[%s2762_s30 + $0x12a] sm:$0xff] }
 0x25e   : > { %v4174_v5 = vpop.permute.xlu2 %1250  ;;  %v1231_v40 = vpop.permute.xlu1 %1230  ;;  %v2442_v35 = vld [vmem:[%s2762_s30 + $0x6a] sm:$0xff] }
 0x25f   : > { %v4178_v37 = vsel %vm1717_vm5, %v4821_v24, %v1231_v40  ;;  %v1229_v46 = vpop.permute.xlu0 %1228  ;;  %v4826_v40 = vld [vmem:[#allocation95_spill] sm:$0xff] }
 0x260   : > { %v4182_v59 = vsel %vm1717_vm5, %v3816_v31, %v1229_v46  ;;  %v1734_v31 = vsel %vm1717_vm5, %v3853_v51, %v4095_v6  ;;  %v2449_v51 = vld [vmem:[%s2762_s30 + $0xc2] sm:$0xff]  ;;  %v1627_v24 = vsel %vm1618_vm2, %v1594_v7, %v4826_v40  ;;  %v2403_v7 = vld [vmem:[%s2762_s30 + $0x198] sm:$0xff] }
 0x261   : > { %v2441_v6 = vld [vmem:[%s2762_s30 + $0x62] sm:$0xff] }
 0x262   : > { %v2426_v46 = vld [vmem:[%s2762_s30 + $0x129] sm:$0xff] }
 0x264   : > { %1512 = vrot.lane.b32.xlu2 %v4822_v23, %s2680_s11  ;;  %1496 = vrot.lane.b32.xlu1 %v2457_v58, %s2680_s11  ;;  %v4827_v58 = vld [vmem:[#allocation102_spill] sm:$0xff] }
 0x265   : > { %1384 = vrot.lane.b32.xlu0 %v4823_v20, %s2679_s10  ;;  %v1660_v23 = vsel %vm1651_vm3, %v1627_v24, %v4827_v58  ;;  %v4828_v20 = vld [vmem:[#allocation42_spill] sm:$0xff]  ;;  %v4834_v24 = vld [vmem:[#allocation108_spill] sm:$0xff] }
 0x266   : > { %v1363_v18 = vpop.permute.xlu2 %1362  ;;  %v1361_v10 = vpop.permute.xlu1 %1360 }
 0x267   : > { %v1249_v14 = vpop.permute.xlu0 %1248  ;;  %v1767_v33 = vsel %vm1750_vm8, %v1734_v31, %v1361_v10  ;;  %v1693_v10 = vsel %vm1684_vm4, %v1660_v23, %v4828_v20  ;;  %v1751_v31 = vsel %vm1750_vm8, %v4045_v34, %v4158_v27  ;;  %v4830_v34 = vld [vmem:[#allocation23_spill] sm:$0xff] }
 0x268   : > { %v1742_v4 = vsel %vm1717_vm5, %v3813_v12, %v1249_v14  ;;  %v4829_v14 = vld [vmem:[#allocation99_spill] sm:$0xff] }
 0x269   : > { %v1775_v12 = vsel %vm1750_vm8, %v1742_v4, %v4123_v8 }
 0x26c   : > { %1242 = vrot.lane.b32.xlu2 %v2394_v62, %s2678_s9  ;;  %1352 = vrot.lane.b32.xlu1 %v2417_v63, %s2679_s10  ;;  %v1726_v62 = vsel %vm1717_vm5, %v1693_v10, %v4127_v13  ;;  %v2418_v13 = vld [vmem:[%s2762_s30 + $0xc9] sm:$0xff] }
 0x26d   : > { %1336 = vrot.lane.b32.xlu0 %v2409_v0, %s2679_s10 }
 0x26e   : > { %v1507_v22 = vpop.permute.xlu2 %1506  ;;  %v1505_v60 = vpop.permute.xlu1 %1504 }
 0x26f   : > { %v1489_v48 = vpop.permute.xlu0 %1488  ;;  %v1808_v11 = vsel %vm1783_vm7, %v1775_v12, %v1505_v60 }
 0x270   : > { %v1800_v28 = vsel %vm1783_vm7, %v1767_v33, %v1489_v48  ;;  %2494 = vmatmul.msk.f32.vlgmr.msra.gmra.mxu3 %vm1825_vm9, %v1808_v11  ;;  %v2410_v48 = vld [vmem:[%s2762_s30 + $0x69] sm:$0xff] }
 0x271   : > { %2486 = vmatmul.msk.f32.vlgmr.msra.gmra.mxu2 %vm1825_vm9, %v1800_v28 }
 0x274   : > { %1480 = vrot.lane.b32.xlu2 %v2449_v51, %s2680_s11  ;;  %1464 = vrot.lane.b32.xlu1 %v2441_v6, %s2680_s11  ;;  %v1743_v6 = vsel %vm1717_vm5, %v3967_v53, %v4174_v5  ;;  %v2395_v53 = vld [vmem:[%s2762_s30 + $0x138] sm:$0xff]  ;;  %v4833_v5 = vld [vmem:[#allocation94_spill] sm:$0xff] }
 0x275   : > { %1258 = vrot.lane.b32.xlu0 %v2402_v45, %s2678_s9 }
 0x276   : > { %v4214_v8 = vpop.permute.xlu2 %1236  ;;  %v1235_v57 = vpop.permute.xlu1 %1234 }
 0x277   : > { %v1345_v25 = vpop.permute.xlu0 %1344  ;;  %v1735_v11 = vsel %vm1717_vm5, %v3850_v38, %v1235_v57 }
 0x278   : > { %v1759_v63 = vsel %vm1750_vm8, %v1726_v62, %v1345_v25  ;;  %v1768_v51 = vsel %vm1750_vm8, %v1735_v11, %v1363_v18  ;;  %v2592_v25 = vld [vmem:[%s2762_s30 + $0x68] sm:$0xff]  ;;  %v4832_v18 = vld [vmem:[#allocation52_spill] sm:$0xff] }
 0x279   : > { %v1562_v30 = vsel %vm1552_vm0, %v2592_v25, %v4831_v44  ;;  %v2467_v11 = vld [vmem:[%s2762_s30 + $0x19a] sm:$0xff] }
 0x27a   : > { %v2404_v25 = vld [vmem:[%s2762_s30 + $0x1a0] sm:$0xff] }
 0x27b   : > { %v2396_v44 = vld [vmem:[%s2762_s30 + $0x140] sm:$0xff] }
 0x27c   : > { %1498 = vrot.lane.b32.xlu2 %v2458_v29, %s2680_s11  ;;  %1386 = vrot.lane.b32.xlu1 %v4829_v14, %s2679_s10  ;;  %v1595_v29 = vsel %vm1585_vm1, %v1562_v30, %v4832_v18  ;;  %v2419_v30 = vld [vmem:[%s2762_s30 + $0xd9] sm:$0xff] }
 0x27d   : > { %1370 = vrot.lane.b32.xlu0 %v2426_v46, %s2679_s10  ;;  %v1628_v40 = vsel %vm1618_vm2, %v1595_v29, %v4833_v5  ;;  %v2428_v5 = vld [vmem:[%s2762_s30 + $0x141] sm:$0xff] }
 0x27e   : > { %v1475_v0 = vpop.permute.xlu2 %1474  ;;  %v1473_v4 = vpop.permute.xlu1 %1472  ;;  %v1661_v46 = vsel %vm1651_vm3, %v1628_v40, %v4834_v24  ;;  %v2443_v40 = vld [vmem:[%s2762_s30 + $0x7a] sm:$0xff] }
 0x27f   : > { %v1457_v60 = vpop.permute.xlu0 %1456  ;;  %v1792_v12 = vsel %vm1783_vm7, %v1759_v63, %v1473_v4  ;;  %v2435_v4 = vld [vmem:[%s2762_s30 + $0x199] sm:$0xff] }
 0x280   : > { %v1784_v33 = vsel %vm1783_vm7, %v1751_v31, %v1457_v60  ;;  %2478 = vmatmul.msk.f32.vlgmr.msra.gmra.mxu1 %vm1825_vm9, %v1792_v12  ;;  %v2427_v31 = vld [vmem:[%s2762_s30 + $0x139] sm:$0xff]  ;;  %v2450_v60 = vld [vmem:[%s2762_s30 + $0xca] sm:$0xff] }
 0x281   : > { %2470 = vmatmul.msk.f32.vlgmr.msra.gmra.mxu0 %vm1825_vm9, %v1784_v33 }
 0x284   : > { %1354 = vrot.lane.b32.xlu2 %v2418_v13, %s2679_s10  ;;  %1338 = vrot.lane.b32.xlu1 %v2410_v48, %s2679_s10  ;;  %v2411_v48 = vld [vmem:[%s2762_s30 + $0x79] sm:$0xff] }
 0x285   : > { %1514 = vrot.lane.b32.xlu0 %v4830_v34, %s2680_s11  ;;  %v2459_v34 = vld [vmem:[%s2762_s30 + $0x13a] sm:$0xff] }
 0x286   : > { %v1493_v27 = vpop.permute.xlu2 %1492  ;;  %v1491_v28 = vpop.permute.xlu1 %1490 }
 0x287   : > { %v1379_v45 = vpop.permute.xlu0 %1378  ;;  %v1801_v38 = vsel %vm1783_vm7, %v1768_v51, %v1491_v28  ;;  %v4836_v51 = vld [vmem:[#allocation43_spill] sm:$0xff] }
 0x288   : > { %v1776_v57 = vsel %vm1750_vm8, %v1743_v6, %v1379_v45  ;;  %2487 = vmatmul.msk.f32.gmra.mxu2 %vm1825_vm9, %v1801_v38  ;;  %v1736_v6 = vsel %vm1717_vm5, %v4836_v51, %v4214_v8 }
 0x289   : > { %v1809_v15 = vsel %vm1783_vm7, %v1776_v57, %v1507_v22  ;;  %v4835_v22 = vld [vmem:[#allocation37_spill] sm:$0xff] }
 0x28a   : > { %2495 = vmatmul.msk.f32.gmra.mxu3 %vm1825_vm9, %v1809_v15  ;;  %v1694_v58 = vsel %vm1684_vm4, %v1661_v46, %v4835_v22  ;;  %v2460_v22 = vld [vmem:[%s2762_s30 + $0x142] sm:$0xff] }
 0x28b   : > { %v1727_v23 = vsel %vm1717_vm5, %v1694_v58, %v4125_v54  ;;  %v2468_v58 = vld [vmem:[%s2762_s30 + $0x1a2] sm:$0xff] }
 0x28c   : > { %1466 = vrot.lane.b32.xlu2 %v2442_v35, %s2680_s11  ;;  %1260 = vrot.lane.b32.xlu1 %v2403_v7, %s2678_s9 }
 0x28d   : > { %1244 = vrot.lane.b32.xlu0 %v2395_v53, %s2678_s9 }
 0x28e   : > { %v4279_v20 = vpop.permute.xlu2 %1348  ;;  %v1347_v10 = vpop.permute.xlu1 %1346 }
 0x28f   : > { %v1760_v14 = vsel %vm1750_vm8, %v1727_v23, %v1347_v10  ;;  %v1331_v62 = vpop.permute.xlu0 %1330  ;;  %v2436_v23 = vld [vmem:[%s2762_s30 + $0x1a1] sm:$0xff] }
 0x290   : > { %v1793_v63 = vsel %vm1783_vm7, %v1760_v14, %v1475_v0  ;;  %v1752_v54 = vsel %vm1750_vm8, %v3924_v50, %v1331_v62  ;;  %v1761_v14 = vsel %vm1750_vm8, %v4042_v26, %v4279_v20 }
 0x291   : > { %2479 = vmatmul.msk.f32.gmra.mxu1 %vm1825_vm9, %v1793_v63 }
 0x294   : > { %1388 = vrot.lane.b32.xlu2 %v2435_v4, %s2679_s10  ;;  %1372 = vrot.lane.b32.xlu1 %v2427_v31, %s2679_s10  ;;  %v2420_v4 = vld [vmem:[%s2762_s30 + $0xe1] sm:$0xff] }
 0x295   : > { %1482 = vrot.lane.b32.xlu0 %v2450_v60, %s2680_s11  ;;  %v2444_v31 = vld [vmem:[%s2762_s30 + $0x82] sm:$0xff] }
 0x296   : > { %v1461_v12 = vpop.permute.xlu2 %1460  ;;  %v1459_v33 = vpop.permute.xlu1 %1458 }
 0x297   : > { %v1253_v13 = vpop.permute.xlu0 %1252  ;;  %v1785_v0 = vsel %vm1783_vm7, %v1752_v54, %v1459_v33  ;;  %v2412_v54 = vld [vmem:[%s2762_s30 + $0x81] sm:$0xff] }
 0x298   : > { %2471 = vmatmul.msk.f32.gmra.mxu0 %vm1825_vm9, %v1785_v0  ;;  %v1744_v8 = vsel %vm1717_vm5, %v3963_v1, %v1253_v13  ;;  %v2451_v1 = vld [vmem:[%s2762_s30 + $0xda] sm:$0xff] }
 0x29c   : > { %1340 = vrot.lane.b32.xlu2 %v2411_v48, %s2679_s10  ;;  %1516 = vrot.lane.b32.xlu1 %v2467_v11, %s2680_s11 }
 0x29d   : > { %1500 = vrot.lane.b32.xlu0 %v2459_v34, %s2680_s11 }
 0x29e   : > { %v1383_v50 = vpop.permute.xlu2 %1382  ;;  %v1381_v28 = vpop.permute.xlu1 %1380 }
 0x29f   : > { %v1365_v45 = vpop.permute.xlu0 %1364 }
 0x2a0   : > { %v1769_v38 = vsel %vm1750_vm8, %v1736_v6, %v1365_v45 }
 0x2a1   : > { %v1802_v57 = vsel %vm1783_vm7, %v1769_v38, %v1493_v27  ;;  %v1777_v27 = vsel %vm1750_vm8, %v1744_v8, %v1381_v28 }
 0x2a2   : > { %2488 = vmatmul.msk.f32.gmra.mxu2 %vm1825_vm9, %v1802_v57 }
 0x2a4   : > { %1262 = vrot.lane.b32.xlu2 %v2404_v25, %s2678_s9  ;;  %1246 = vrot.lane.b32.xlu1 %v2396_v44, %s2678_s9  ;;  %s2275_s9 = sshll.u32 %s218_s8, 8 }
 0x2a5   : > { %1356 = vrot.lane.b32.xlu0 %v2419_v30, %s2679_s10 }
 0x2a6   : > { %v1335_v15 = vpop.permute.xlu2 %1334  ;;  %v1333_v35 = vpop.permute.xlu1 %1332 }
 0x2a7   : > { %v1753_v7 = vsel %vm1750_vm8, %v4067_v3, %v1333_v35  ;;  %v1509_v18 = vpop.permute.xlu0 %1508  ;;  %v1754_v45 = vsel %vm1750_vm8, %v4063_v49, %v1335_v15 }
 0x2a8   : > { %v1810_v29 = vsel %vm1783_vm7, %v1777_v27, %v1509_v18  ;;  %v1786_v53 = vsel %vm1783_vm7, %v1753_v7, %v1461_v12 }
 0x2a9   : > { %2496 = vmatmul.msk.f32.gmra.mxu3 %vm1825_vm9, %v1810_v29  ;;  %2472 = vmatmul.msk.f32.gmra.mxu0 %vm1825_vm9, %v1786_v53 }
 0x2ac   : > { %1484 = vrot.lane.b32.xlu1 %v2451_v1, %s2680_s11  ;;  %1374 = vrot.lane.b32.xlu2 %v2428_v5, %s2679_s10 }
 0x2ad   : > { %1468 = vrot.lane.b32.xlu0 %v2443_v40, %s2680_s11 }
 0x2ae   : > { %v1255_v3 = vpop.permute.xlu1 %1254  ;;  %v1257_v46 = vpop.permute.xlu2 %1256 }
 0x2af   : > { %v1239_v24 = vpop.permute.xlu0 %1238  ;;  %v1745_v12 = vsel %vm1717_vm5, %v3847_v39, %v1255_v3  ;;  %v2452_v39 = vld [vmem:[%s2762_s30 + $0xe2] sm:$0xff] }
 0x2b0   : > { %v1737_v26 = vsel %vm1717_vm5, %v3896_v19, %v1239_v24  ;;  %v1778_v33 = vsel %vm1750_vm8, %v1745_v12, %v1383_v50 }
 0x2b4   : > { %1502 = vrot.lane.b32.xlu1 %v2460_v22, %s2680_s11  ;;  %1518 = vrot.lane.b32.xlu2 %v2468_v58, %s2680_s11 }
 0x2b5   : > { %1390 = vrot.lane.b32.xlu0 %v2436_v23, %s2679_s10  ;;  %v4388_v23 = vld [vmem:[%s4552_s2] ss:$0 sm:$0xff] }
 0x2b6   : > { %v1367_v10 = vpop.permute.xlu1 %1366  ;;  %v1369_v60 = vpop.permute.xlu2 %1368 }
 0x2b7   : > { %v1477_v62 = vpop.permute.xlu0 %1476  ;;  %v1770_v13 = vsel %vm1750_vm8, %v1737_v26, %v1367_v10 }
 0x2b8   : > { %v1794_v63 = vsel %vm1783_vm7, %v1761_v14, %v1477_v62 }
 0x2b9   : > { %2480 = vmatmul.msk.f32.gmra.mxu1 %vm1825_vm9, %v1794_v63 }
 0x2bc   : > { %1358 = vrot.lane.b32.xlu1 %v2420_v4, %s2679_s10  ;;  %1470 = vrot.lane.b32.xlu2 %v2444_v31, %s2680_s11 }
 0x2bd   : > { %1342 = vrot.lane.b32.xlu0 %v2412_v54, %s2679_s10  ;;  %s4406_s10 = scalar_lea.vmem [#allocation2], %s2275_s9 }
 0x2be   : > { %v1511_v20 = vpop.permute.xlu1 %1510  ;;  %v1513_v34 = vpop.permute.xlu2 %1512  ;;  %s2152_s23 = sshll.u32 %s4406_s10, 4  ;;  %s2153_s23 = int_to_ptr.vmem [resolvable:$true] %s2152_s23 }
 0x2bf   : > { %v1495_v0 = vpop.permute.xlu0 %1494  ;;  %v1811_v48 = vsel %vm1783_vm7, %v1778_v33, %v1511_v20 }
 0x2c0   : > { %v1803_v11 = vsel %vm1783_vm7, %v1770_v13, %v1495_v0  ;;  %2497 = vmatmul.msk.f32.gmra.mxu3 %vm1825_vm9, %v1811_v48 }
 0x2c1   : > { %2489 = vmatmul.msk.f32.gmra.mxu2 %vm1825_vm9, %v1803_v11 }
 0x2c5   : > { %1486 = vrot.lane.b32.xlu0 %v2452_v39, %s2680_s11  ;;  %s2507_s11 = sshll.u32 %s2663_s15, 8  ;;  %s2136_s15 = scalar_lea.sflag [#allocation3], %s218_s8 }
 0x2c6   : > { %v1241_v28 = vpop.permute.xlu1 %1240  ;;  %v1243_v51 = vpop.permute.xlu2 %1242  ;;  %s2151_s21 = scalar_lea.hbm %s4553_s3, %s2507_s11 }
 0x2c7   : > { %v1351_v19 = vpop.permute.xlu0 %1350  ;;  %v1738_v44 = vsel %vm1717_vm5, %v3893_v16, %v1241_v28  ;;  %s2154_s26 = sshll.u32 %s2151_s21, 4  ;;  %s2155_s26 = int_to_ptr.hbm [resolvable:$true] %s2154_s26 }
 0x2c8   : > { %v1762_v50 = vsel %vm1750_vm8, %v4166_v61, %v1351_v19  ;;  %v1771_v8 = vsel %vm1750_vm8, %v1738_v44, %v1369_v60  ;;  %v1746_v61 = vsel %vm1717_vm5, %v4012_v2, %v1257_v46  ;;  %s2607_s27 = sshra.s32 %s2155_s26, 4  ;;  %s2608_s27 = int_to_ptr.hbm [resolvable:$true] %s2607_s27 }
 0x2c9   : > { %s2609_s28 = scalar_lea.hbm %s2608_s27, 256  ;;  %p2614_p1 = scmp.lt.s32.totalorder %s2608_s27, %s4553_s3 }
 0x2ca   : > { %p2610_p12 = scmp.ne.s32.totalorder %s2608_s27, %s2609_s28  ;;  %p2615_p2 = scmp.lt.s32.totalorder %s2613_s6, %s2609_s28 }
 0x2cc   : > { %p2611_p13 = pnand %p2610_p12, %p2742_p4  ;;  %p2616_p3 = por %p2615_p2, %p2614_p1 }
 0x2ce   : > { %v1479_v6 = vpop.permute.xlu1 %1478  ;;  %v1481_v15 = vpop.permute.xlu2 %1480  ;;  %p2612_p0 = pneg %p2611_p13 }
 0x2cf   : > { %v1463_v38 = vpop.permute.xlu0 %1462  ;;  %v1795_v57 = vsel %vm1783_vm7, %v1762_v50, %v1479_v6 }
 0x2d0   : > { %v1787_v25 = vsel %vm1783_vm7, %v1754_v45, %v1463_v38  ;;  %2481 = vmatmul.msk.f32.gmra.mxu1 %vm1825_vm9, %v1795_v57  ;;  %p2617_p5 = pnand %p2616_p3, %p2612_p0 }
 0x2d1   : > { %2473 = vmatmul.msk.f32.gmra.mxu0 %vm1825_vm9, %v1787_v25 }
 0x2d6   : > { %v1497_v30 = vpop.permute.xlu1 %1496  ;;  %v1499_v53 = vpop.permute.xlu2 %1498 }
 0x2d7   : > { %v1385_v35 = vpop.permute.xlu0 %1384  ;;  %v1804_v49 = vsel %vm1783_vm7, %v1771_v8, %v1497_v30 }
 0x2d8   : > { %v1779_v27 = vsel %vm1750_vm8, %v1746_v61, %v1385_v35  ;;  %2490 = vmatmul.msk.f32.gmra.mxu2 %vm1825_vm9, %v1804_v49 }
 0x2d9   : > { %v1812_v7 = vsel %vm1783_vm7, %v1779_v27, %v1513_v34 }
 0x2da   : > { %2498 = vmatmul.msk.f32.gmra.mxu3 %vm1825_vm9, %v1812_v7 }
 0x2de   : > { %v1353_v18 = vpop.permute.xlu1 %1352  ;;  %v1355_v24 = vpop.permute.xlu2 %1354 }
 0x2df   : > { %v1763_v16 = vsel %vm1750_vm8, %v4163_v42, %v1353_v18  ;;  %v1337_v29 = vpop.permute.xlu0 %1336  ;;  %v1739_v42 = vsel %vm1717_vm5, %v3783_v21, %v1243_v51  ;;  %v1764_v38 = vsel %vm1750_vm8, %v4059_v52, %v1355_v24 }
 0x2e0   : > { %v1796_v2 = vsel %vm1783_vm7, %v1763_v16, %v1481_v15  ;;  %v1755_v1 = vsel %vm1750_vm8, %v3960_v56, %v1337_v29 }
 0x2e1   : > { %2482 = vmatmul.msk.f32.gmra.mxu1 %vm1825_vm9, %v1796_v2 }
 0x2e6   : > { %v1465_v5 = vpop.permute.xlu1 %1464  ;;  %v1467_v63 = vpop.permute.xlu2 %1466 }
 0x2e7   : > { %v1259_v40 = vpop.permute.xlu0 %1258  ;;  %v1788_v3 = vsel %vm1783_vm7, %v1755_v1, %v1465_v5 }
 0x2e8   : > { %2474 = vmatmul.msk.f32.gmra.mxu0 %vm1825_vm9, %v1788_v3  ;;  %v1747_v4 = vsel %vm1717_vm5, %v4009_v32, %v1259_v40 }
 0x2ee   : > { %v1387_v46 = vpop.permute.xlu1 %1386  ;;  %v1389_v19 = vpop.permute.xlu2 %1388 }
 0x2ef   : > { %v1371_v22 = vpop.permute.xlu0 %1370  ;;  %v1780_v54 = vsel %vm1750_vm8, %v1747_v4, %v1387_v46 }
 0x2f0   : > { %v1772_v58 = vsel %vm1750_vm8, %v1739_v42, %v1371_v22 }
 0x2f1   : > { %v1805_v56 = vsel %vm1783_vm7, %v1772_v58, %v1499_v53 }
 0x2f2   : > { %2491 = vmatmul.msk.f32.gmra.mxu2 %vm1825_vm9, %v1805_v56 }
 0x2f3   : > { %v2015_v10 = vpop.f32.mrf.mxu3 }
 0x2f4   : > { %v1991_v14 = vpop.f32.mrf.mxu2  ;;  %v2016_v62 = vadd.f32 %v4388_v23, %v2015_v10 }
 0x2f5   : > { %v1992_v21 = vadd.f32 %v4388_v23, %v1991_v14 }
 0x2f6   : > { %v2063_v31 = vmul.f32 0.1, %v2016_v62  ;;  %v1339_v60 = vpop.permute.xlu1 %1338  ;;  %v1341_v30 = vpop.permute.xlu2 %1340 }
 0x2f7   : > { %v2055_v12 = vmul.f32 0.1, %v1992_v21  ;;  %v1756_v26 = vsel %vm1750_vm8, %v4106_v17, %v1339_v60  ;;  %v1515_v20 = vpop.permute.xlu0 %1514 }
 0x2f8   : > { %v2095_v33 = vmax.f32 %v2016_v62, %v2063_v31  ;;  %v1813_v13 = vsel %vm1783_vm7, %v1780_v54, %v1515_v20  ;;  %v1789_v0 = vsel %vm1783_vm7, %v1756_v26, %v1467_v63 }
 0x2f9   : > { %v2087_v48 = vmax.f32 %v1992_v21, %v2055_v12  ;;  %2499 = vmatmul.msk.f32.gmra.mxu3 %vm1825_vm9, %v1813_v13  ;;  %2475 = vmatmul.msk.f32.gmra.mxu0 %vm1825_vm9, %v1789_v0  ;;  %v1757_v21 = vsel %vm1750_vm8, %v4100_v36, %v1341_v30 }
 0x2fa   : > { %2127 = vst [vmem:[%s4406_s10 + $0xc0] sm:$0xff] %v2095_v33 }
 0x2fb   : > { %2119 = vst [vmem:[%s4406_s10 + $0x80] sm:$0xff] %v2087_v48 }
 0x2fd   : > { %v1967_v32 = vpop.f32.mrf.mxu1 }
 0x2fe   : > { %v1943_v17 = vpop.f32.mrf.mxu0  ;;  %v1968_v11 = vadd.f32 %v4388_v23, %v1967_v32  ;;  %v1261_v34 = vpop.permute.xlu1 %1260 }
 0x2ff   : > { %v1944_v39 = vadd.f32 %v4388_v23, %v1943_v17  ;;  %v1245_v28 = vpop.permute.xlu0 %1244  ;;  %v1748_v61 = vsel %vm1717_vm5, %v3890_v43, %v1261_v34  ;;  %v1263_v46 = vpop.permute.xlu2 %1262 }
 0x300   : > { %v2047_v51 = vmul.f32 0.1, %v1968_v11  ;;  %v1740_v15 = vsel %vm1717_vm5, %v3931_v47, %v1245_v28  ;;  %v1781_v43 = vsel %vm1750_vm8, %v1748_v61, %v1389_v19 }
 0x301   : > { %v2039_v50 = vmul.f32 0.1, %v1944_v39 }
 0x302   : > { %v2079_v6 = vmax.f32 %v1968_v11, %v2047_v51 }
 0x303   : > { %v2071_v45 = vmax.f32 %v1944_v39, %v2039_v50 }
 0x304   : > { %2111 = vst [vmem:[%s4406_s10 + $0x40] sm:$0xff] %v2079_v6 }
 0x305   : > { %2103 = vst [vmem:[%s4406_s10] sm:$0xff] %v2071_v45 }
 0x306   : > { %v1373_v57 = vpop.permute.xlu1 %1372 }
 0x307   : > { %v1483_v25 = vpop.permute.xlu0 %1482  ;;  %v1773_v18 = vsel %vm1750_vm8, %v1740_v15, %v1373_v57  ;;  %v1375_v62 = vpop.permute.xlu2 %1374 }
 0x308   : > { %v1797_v44 = vsel %vm1783_vm7, %v1764_v38, %v1483_v25 }
 0x309   : > { %2483 = vmatmul.msk.f32.gmra.mxu1 %vm1825_vm9, %v1797_v44 }
 0x30b   : > { %v1994_v8 = vpop.f32.mrf.mxu2 }
 0x30c   : > { %v1995_v35 = vadd.f32 %v4388_v23, %v1994_v8 }
 0x30d   : > { %v2018_v49 = vpop.f32.mrf.mxu3 }
 0x30e   : > { %v2056_v27 = vmul.f32 0.1, %v1995_v35  ;;  %v2019_v52 = vadd.f32 %v4388_v23, %v2018_v49  ;;  %v1970_v7 = vpop.f32.mrf.mxu1  ;;  %v1517_v16 = vpop.permute.xlu1 %1516 }
 0x30f   : > { %v1501_v29 = vpop.permute.xlu0 %1500  ;;  %v1971_v2 = vadd.f32 %v4388_v23, %v1970_v7  ;;  %v1814_v47 = vsel %vm1783_vm7, %v1781_v43, %v1517_v16  ;;  %v1519_v26 = vpop.permute.xlu2 %1518 }
 0x310   : > { %v2088_v53 = vmax.f32 %v1995_v35, %v2056_v27  ;;  %v2064_v1 = vmul.f32 0.1, %v2019_v52  ;;  %v1806_v5 = vsel %vm1783_vm7, %v1773_v18, %v1501_v29  ;;  %2500 = vmatmul.msk.f32.gmra.mxu3 %vm1825_vm9, %v1814_v47 }
 0x311   : > { %v2048_v40 = vmul.f32 0.1, %v1971_v2  ;;  %2492 = vmatmul.msk.f32.gmra.mxu2 %vm1825_vm9, %v1806_v5 }
 0x312   : > { %2120 = vst [vmem:[%s4406_s10 + $0x88] sm:$0xff] %v2088_v53  ;;  %v2096_v3 = vmax.f32 %v2019_v52, %v2064_v1 }
 0x313   : > { %v2080_v24 = vmax.f32 %v1971_v2, %v2048_v40 }
 0x314   : > { %2128 = vst [vmem:[%s4406_s10 + $0xc8] sm:$0xff] %v2096_v3 }
 0x315   : > { %2112 = vst [vmem:[%s4406_s10 + $0x48] sm:$0xff] %v2080_v24  ;;  %v1946_v42 = vpop.f32.mrf.mxu0 }
 0x316   : > { %v1947_v22 = vadd.f32 %v4388_v23, %v1946_v42  ;;  %v1247_v58 = vpop.permute.xlu1 %1246 }
 0x317   : > { %v1357_v56 = vpop.permute.xlu0 %1356  ;;  %v1741_v12 = vsel %vm1717_vm5, %v3927_v55, %v1247_v58  ;;  %v1471_v50 = vpop.permute.xlu2 %1470 }
 0x318   : > { %v2040_v10 = vmul.f32 0.1, %v1947_v22  ;;  %v1765_v63 = vsel %vm1750_vm8, %v4182_v59, %v1357_v56  ;;  %v1749_v59 = vsel %vm1717_vm5, %v4049_v9, %v1263_v46  ;;  %v1774_v13 = vsel %vm1750_vm8, %v1741_v12, %v1375_v62 }
 0x31a   : > { %v2072_v14 = vmax.f32 %v1947_v22, %v2040_v10 }
 0x31c   : > { %2104 = vst [vmem:[%s4406_s10 + $0x8] sm:$0xff] %v2072_v14 }
 0x31e   : > { %v1485_v4 = vpop.permute.xlu1 %1484 }
 0x31f   : > { %v1469_v31 = vpop.permute.xlu0 %1468  ;;  %v1798_v54 = vsel %vm1783_vm7, %v1765_v63, %v1485_v4 }
 0x320   : > { %v1790_v60 = vsel %vm1783_vm7, %v1757_v21, %v1469_v31  ;;  %2484 = vmatmul.msk.f32.gmra.mxu1 %vm1825_vm9, %v1798_v54 }
 0x321   : > { %2476 = vmatmul.msk.f32.gmra.mxu0 %vm1825_vm9, %v1790_v60 }
 0x325   : > { %v1997_v20 = vpop.f32.mrf.mxu2 }
 0x326   : > { %v1998_v36 = vadd.f32 %v4388_v23, %v1997_v20  ;;  %v1949_v33 = vpop.f32.mrf.mxu0  ;;  %v1503_v0 = vpop.permute.xlu1 %1502 }
 0x327   : > { %v1391_v48 = vpop.permute.xlu0 %1390  ;;  %v1950_v32 = vadd.f32 %v4388_v23, %v1949_v33  ;;  %v1807_v55 = vsel %vm1783_vm7, %v1774_v13, %v1503_v0 }
 0x328   : > { %v2057_v17 = vmul.f32 0.1, %v1998_v36  ;;  %v1782_v11 = vsel %vm1750_vm8, %v1749_v59, %v1391_v48  ;;  %2493 = vmatmul.msk.f32.gmra.mxu2 %vm1825_vm9, %v1807_v55 }
 0x329   : > { %v2041_v39 = vmul.f32 0.1, %v1950_v32  ;;  %v1815_v34 = vsel %vm1783_vm7, %v1782_v11, %v1519_v26 }
 0x32a   : > { %v2089_v28 = vmax.f32 %v1998_v36, %v2057_v17  ;;  %2501 = vmatmul.msk.f32.gmra.mxu3 %vm1825_vm9, %v1815_v34 }
 0x32b   : > { %v2073_v9 = vmax.f32 %v1950_v32, %v2041_v39 }
 0x32c   : > { %2121 = vst [vmem:[%s4406_s10 + $0x90] sm:$0xff] %v2089_v28  ;;  %v2021_v19 = vpop.f32.mrf.mxu3 }
 0x32d   : > { %2105 = vst [vmem:[%s4406_s10 + $0x10] sm:$0xff] %v2073_v9  ;;  %v2022_v51 = vadd.f32 %v4388_v23, %v2021_v19 }
 0x32e   : > { %v1359_v44 = vpop.permute.xlu1 %1358 }
 0x32f   : > { %v2065_v6 = vmul.f32 0.1, %v2022_v51  ;;  %v1343_v45 = vpop.permute.xlu0 %1342  ;;  %v1766_v8 = vsel %vm1750_vm8, %v4178_v37, %v1359_v44 }
 0x330   : > { %v1758_v38 = vsel %vm1750_vm8, %v4006_v41, %v1343_v45 }
 0x331   : > { %v2097_v57 = vmax.f32 %v2022_v51, %v2065_v6  ;;  %v1791_v25 = vsel %vm1783_vm7, %v1758_v38, %v1471_v50 }
 0x332   : > { %2477 = vmatmul.msk.f32.gmra.mxu0 %vm1825_vm9, %v1791_v25 }
 0x333   : > { %2129 = vst [vmem:[%s4406_s10 + $0xd0] sm:$0xff] %v2097_v57 }
 0x336   : > { %v1973_v30 = vpop.f32.mrf.mxu1 }
 0x337   : > { %v1974_v61 = vadd.f32 %v4388_v23, %v1973_v30  ;;  %v1487_v35 = vpop.permute.xlu0 %1486 }
 0x338   : > { %v1799_v49 = vsel %vm1783_vm7, %v1766_v8, %v1487_v35 }
 0x339   : > { %v2049_v15 = vmul.f32 0.1, %v1974_v61  ;;  %2485 = vmatmul.msk.f32.gmra.mxu1 %vm1825_vm9, %v1799_v49 }
 0x33b   : > { %v2081_v41 = vmax.f32 %v1974_v61, %v2049_v15 }
 0x33d   : > { %2113 = vst [vmem:[%s4406_s10 + $0x50] sm:$0xff] %v2081_v41 }
 0x343   : > { %v2024_v27 = vpop.f32.mrf.mxu3 }
 0x344   : > { %v2000_v52 = vpop.f32.mrf.mxu2  ;;  %v2025_v7 = vadd.f32 %v4388_v23, %v2024_v27 }
 0x345   : > { %v2001_v18 = vadd.f32 %v4388_v23, %v2000_v52 }
 0x346   : > { %v2066_v37 = vmul.f32 0.1, %v2025_v7 }
 0x347   : > { %v2058_v16 = vmul.f32 0.1, %v2001_v18 }
 0x348   : > { %v2098_v29 = vmax.f32 %v2025_v7, %v2066_v37 }
 0x349   : > { %v2090_v2 = vmax.f32 %v2001_v18, %v2058_v16 }
 0x34a   : > { %2130 = vst [vmem:[%s4406_s10 + $0xd8] sm:$0xff] %v2098_v29 }
 0x34b   : > { %2122 = vst [vmem:[%s4406_s10 + $0x98] sm:$0xff] %v2090_v2 }
 0x34d   : > { %v1976_v43 = vpop.f32.mrf.mxu1 }
 0x34e   : > { %v1952_v53 = vpop.f32.mrf.mxu0  ;;  %v1977_v1 = vadd.f32 %v4388_v23, %v1976_v43 }
 0x34f   : > { %v1953_v5 = vadd.f32 %v4388_v23, %v1952_v53 }
 0x350   : > { %v2050_v47 = vmul.f32 0.1, %v1977_v1 }
 0x351   : > { %v2042_v40 = vmul.f32 0.1, %v1953_v5 }
 0x352   : > { %v2082_v3 = vmax.f32 %v1977_v1, %v2050_v47 }
 0x353   : > { %v2074_v24 = vmax.f32 %v1953_v5, %v2042_v40 }
 0x354   : > { %2114 = vst [vmem:[%s4406_s10 + $0x58] sm:$0xff] %v2082_v3 }
 0x355   : > { %2106 = vst [vmem:[%s4406_s10 + $0x18] sm:$0xff] %v2074_v24 }
 0x35b   : > { %v2003_v46 = vpop.f32.mrf.mxu2 }
 0x35c   : > { %v2004_v42 = vadd.f32 %v4388_v23, %v2003_v46 }
 0x35d   : > { %v2027_v22 = vpop.f32.mrf.mxu3 }
 0x35e   : > { %v2059_v58 = vmul.f32 0.1, %v2004_v42  ;;  %v2028_v56 = vadd.f32 %v4388_v23, %v2027_v22  ;;  %v1979_v10 = vpop.f32.mrf.mxu1 }
 0x35f   : > { %v1980_v14 = vadd.f32 %v4388_v23, %v1979_v10 }
 0x360   : > { %v2091_v62 = vmax.f32 %v2004_v42, %v2059_v58  ;;  %v2067_v21 = vmul.f32 0.1, %v2028_v56 }
 0x361   : > { %v2051_v63 = vmul.f32 0.1, %v1980_v14 }
 0x362   : > { %2123 = vst [vmem:[%s4406_s10 + $0xa0] sm:$0xff] %v2091_v62  ;;  %v2099_v4 = vmax.f32 %v2028_v56, %v2067_v21 }
 0x363   : > { %v2083_v31 = vmax.f32 %v1980_v14, %v2051_v63 }
 0x364   : > { %2131 = vst [vmem:[%s4406_s10 + $0xe0] sm:$0xff] %v2099_v4 }
 0x365   : > { %2115 = vst [vmem:[%s4406_s10 + $0x60] sm:$0xff] %v2083_v31  ;;  %v1955_v60 = vpop.f32.mrf.mxu0 }
 0x366   : > { %v1956_v54 = vadd.f32 %v4388_v23, %v1955_v60 }
 0x368   : > { %v2043_v12 = vmul.f32 0.1, %v1956_v54 }
 0x36a   : > { %v2075_v26 = vmax.f32 %v1956_v54, %v2043_v12 }
 0x36c   : > { %2107 = vst [vmem:[%s4406_s10 + $0x20] sm:$0xff] %v2075_v26 }
 0x375   : > { %v2006_v20 = vpop.f32.mrf.mxu2 }
 0x376   : > { %v2007_v36 = vadd.f32 %v4388_v23, %v2006_v20  ;;  %v1958_v33 = vpop.f32.mrf.mxu0 }
 0x377   : > { %v1959_v59 = vadd.f32 %v4388_v23, %v1958_v33 }
 0x378   : > { %v2060_v13 = vmul.f32 0.1, %v2007_v36 }
 0x379   : > { %v2044_v0 = vmul.f32 0.1, %v1959_v59 }
 0x37a   : > { %v2092_v48 = vmax.f32 %v2007_v36, %v2060_v13 }
 0x37b   : > { %v2076_v32 = vmax.f32 %v1959_v59, %v2044_v0 }
 0x37c   : > { %2124 = vst [vmem:[%s4406_s10 + $0xa8] sm:$0xff] %v2092_v48  ;;  %v2030_v17 = vpop.f32.mrf.mxu3 }
 0x37d   : > { %2108 = vst [vmem:[%s4406_s10 + $0x28] sm:$0xff] %v2076_v32  ;;  %v2031_v11 = vadd.f32 %v4388_v23, %v2030_v17 }
 0x37f   : > { %v2068_v55 = vmul.f32 0.1, %v2031_v11 }
 0x381   : > { %v2100_v39 = vmax.f32 %v2031_v11, %v2068_v55 }
 0x383   : > { %2132 = vst [vmem:[%s4406_s10 + $0xe8] sm:$0xff] %v2100_v39 }
 0x386   : > { %v1982_v34 = vpop.f32.mrf.mxu1 }
 0x387   : > { %v1983_v28 = vadd.f32 %v4388_v23, %v1982_v34 }
 0x389   : > { %v2052_v9 = vmul.f32 0.1, %v1983_v28 }
 0x38b   : > { %v2084_v19 = vmax.f32 %v1983_v28, %v2052_v9 }
 0x38d   : > { %2116 = vst [vmem:[%s4406_s10 + $0x68] sm:$0xff] %v2084_v19 }
 0x393   : > { %v2033_v50 = vpop.f32.mrf.mxu3 }
 0x394   : > { %v2009_v51 = vpop.f32.mrf.mxu2  ;;  %v2034_v45 = vadd.f32 %v4388_v23, %v2033_v50 }
 0x395   : > { %v2010_v6 = vadd.f32 %v4388_v23, %v2009_v51 }
 0x396   : > { %v2069_v57 = vmul.f32 0.1, %v2034_v45 }
 0x397   : > { %v2061_v38 = vmul.f32 0.1, %v2010_v6 }
 0x398   : > { %v2101_v44 = vmax.f32 %v2034_v45, %v2069_v57 }
 0x399   : > { %v2093_v25 = vmax.f32 %v2010_v6, %v2061_v38 }
 0x39a   : > { %2133 = vst [vmem:[%s4406_s10 + $0xf0] sm:$0xff] %v2101_v44 }
 0x39b   : > { %2125 = vst [vmem:[%s4406_s10 + $0xb0] sm:$0xff] %v2093_v25 }
 0x39d   : > { %v1985_v8 = vpop.f32.mrf.mxu1 }
 0x39e   : > { %v1961_v30 = vpop.f32.mrf.mxu0  ;;  %v1986_v35 = vadd.f32 %v4388_v23, %v1985_v8 }
 0x39f   : > { %v1962_v61 = vadd.f32 %v4388_v23, %v1961_v30 }
 0x3a0   : > { %v2053_v15 = vmul.f32 0.1, %v1986_v35 }
 0x3a1   : > { %v2045_v49 = vmul.f32 0.1, %v1962_v61 }
 0x3a2   : > { %v2085_v27 = vmax.f32 %v1986_v35, %v2053_v15 }
 0x3a3   : > { %v2077_v41 = vmax.f32 %v1962_v61, %v2045_v49 }
 0x3a4   : > { %2117 = vst [vmem:[%s4406_s10 + $0x70] sm:$0xff] %v2085_v27 }
 0x3a5   : > { %2109 = vst [vmem:[%s4406_s10 + $0x30] sm:$0xff] %v2077_v41 }
 0x3ab   : > { %v2012_v52 = vpop.f32.mrf.mxu2 }
 0x3ac   : > { %v2013_v7 = vadd.f32 %v4388_v23, %v2012_v52 }
 0x3ad   : > { %v2036_v18 = vpop.f32.mrf.mxu3 }
 0x3ae   : > { %v2037_v37 = vadd.f32 %v4388_v23, %v2036_v18  ;;  %v2062_v16 = vmul.f32 0.1, %v2013_v7 }
 0x3af   : > { %v1964_v29 = vpop.f32.mrf.mxu0 }
 0x3b0   : > { %v2070_v2 = vmul.f32 0.1, %v2037_v37  ;;  %v1965_v43 = vadd.f32 %v4388_v23, %v1964_v29  ;;  %v2094_v53 = vmax.f32 %v2013_v7, %v2062_v16 }
 0x3b2   : > { %v2102_v1 = vmax.f32 %v2037_v37, %v2070_v2  ;;  %v2046_v5 = vmul.f32 0.1, %v1965_v43  ;;  %2126 = vst [vmem:[%s4406_s10 + $0xb8] sm:$0xff] %v2094_v53 }
 0x3b4   : > { %2134 = vst [vmem:[%s4406_s10 + $0xf8] sm:$0xff] %v2102_v1  ;;  %v2078_v47 = vmax.f32 %v1965_v43, %v2046_v5 }
 0x3b6   : > { %2110 = vst [vmem:[%s4406_s10 + $0x38] sm:$0xff] %v2078_v47  ;;  %v1988_v40 = vpop.f32.mrf.mxu1 }
 0x3b7   : > { %v1989_v3 = vadd.f32 %v4388_v23, %v1988_v40 }
 0x3b9   : > { %v2054_v24 = vmul.f32 0.1, %v1989_v3 }
 0x3bb   : > { %v2086_v46 = vmax.f32 %v1989_v3, %v2054_v24 }
 0x3bd   : > { %2118 = vst [vmem:[%s4406_s10 + $0x78] sm:$0xff] %v2086_v46 }
 0x3be   : > { %2620 = shalt.err (!%p2617_p5)
}
 0x3bf   : > { %s2681_s8 = smov 128  }
 0x3c0   : > { %2524 = dma.vmem_to_hbm [thread:$0]  (%p2742_p4), %s2153_s23, 4096, %s2155_s26, %s2136_s15, %s2681_s8, %s2681_s8, %s2674_s5  }
 0x3c1 PF: > { %p2530_p6 = scmp.ge.s32.totalorder %s2671_s17, 2  ;;  %s2169_s9 = sand.u32 1, %s2651_s12  }
 0x3c2   : > { %s2170_s10 = scalar_lea.sflag [#allocation3], %s2169_s9 }
 0x3c3   : > { %p2527_p7 = pnand %p2530_p6, %p2749_p8 }
 0x3c5   : > { %p2528_p9 = pneg %p2527_p7 }
 0x3c7   : > { %2646 = dma.done.wait (%p2528_p9), %s2170_s10, 4096  }
 0x3c8   : > { %2648 = vsyncadd (%p2528_p9), %s2170_s10, 4294963200  ;;  %s16_s17 = sadd.s32 1, %s2671_s17   ;;  %s4837_s12 = smov %s2655_s13 }
 0x3c9   : > { %p13_p10 = scmp.ge.s32.totalorder %s16_s17, 4   ;;  %s4838_s13 = smov %s2659_s14 }
 0x3ca   : > { %s4839_s14 = smov %s2755_s25  ;;  %s4840_s15 = smov %s2667_s16 }
 0x3cb   : > { %s4841_s16 = smov %s4843_s20  ;;  %15 = sbr.rel (!%p13_p10) target bundleno = 4 (0x4), region = 75 }
 0x3d0   :  { %2176 = vsyncpa [#allocation3], 1 }
 0x3d1   :  { %2178 = vsyncpa [#allocation3 + $0x1], 1 }

</bundles_post_ra>
